<compile_context>
chip_gen: v7x
topology: tpu7x:2x2x1
jax: 0.10.0
libtpu: 0.0.40
codegen_flags: <defaults>
</compile_context>

<pallas_src>
import jax
import jax.numpy as jnp
import numpy as np
from jax.experimental import pallas as pl
from jax.experimental.pallas import tpu as pltpu


def _sigmoid_exact(x):
    return 1.0 / (1.0 + jnp.exp(-x))


def gru_kernel(x_ref, wih1_ref, bi1_ref, whh_ref, wih2_ref, bi2_ref, bhn_ref,
               o_ref):
    """Two-layer GRU recurrence, whole sequence in one invocation.

    x_ref:    (T*B, E)  time-major flattened input.
    wih1_ref: (E, 3H)   layer-1 input weight, pre-transposed (gate order r|z|n).
    bi1_ref:  (1, 3H)   b_ih1 with the r/z slices of b_hh1 folded in.
    whh_ref:  (2H, 6H)  block-diagonal [[whh1^T, 0], [0, whh2^T]].
    wih2_ref: (H, 3H)   layer-2 input weight, pre-transposed.
    bi2_ref:  (1, 3H)   b_ih2 with the r/z slices of b_hh2 folded in.
    bhn_ref:  (1, 2H)   [b_hh1_n | b_hh2_n] (n-gate hidden biases, scaled by r).
    o_ref:    (B, H)    final layer-2 hidden state (== out[:, -1, :]).
    """
    TB, E = x_ref.shape
    B, H = o_ref.shape
    T = TB // B
    G3 = 3 * H

    wih2 = wih2_ref[...]
    whh = whh_ref[...]

    # Preamble: layer-1 input projection for ALL timesteps in one matmul,
    # off the recurrent critical path. r/z hidden biases already folded in.
    xproj = jnp.dot(x_ref[...], wih1_ref[...],
                    preferred_element_type=jnp.float32)
    xproj = xproj + jnp.broadcast_to(bi1_ref[...], (TB, G3))

    # Hoisted bias broadcasts (broadcasts are not CSE'd inside loops).
    bi2 = jnp.broadcast_to(bi2_ref[...], (B, G3))
    bhn = bhn_ref[...]
    bhn1 = jnp.broadcast_to(bhn[:, :H], (B, H))
    bhn2 = jnp.broadcast_to(bhn[:, H:], (B, H))

    def sigmoid_fast(v):
        # EUP tanh instead of a VPU Newton-Raphson divide.
        return 0.5 * (jnp.tanh(0.5 * v) + 1.0)

    def gru_cell(gi, gh, bhn_n, h_prev):
        # gi already carries b_ih plus the r/z slices of b_hh.
        rz = sigmoid_fast(gi[:, :2 * H] + gh[:, :2 * H])   # fused r|z gate
        r = rz[:, :H]
        z = rz[:, H:]
        n = jnp.tanh(gi[:, 2 * H:] + r * (gh[:, 2 * H:] + bhn_n))
        return (1.0 - z) * n + z * h_prev

    h1 = jnp.zeros((B, H), jnp.float32)
    h2 = jnp.zeros((B, H), jnp.float32)

    # T is static and small -> full unroll for max LLO scheduling visibility.
    for t in range(T):
        gi1 = xproj[t * B:(t + 1) * B, :]
        # Fused recurrent matmul for BOTH layers (block-diag rhs); gh1/gh2
        # only depend on previous-step state, so they are computed up front.
        h12 = jnp.concatenate([h1, h2], axis=1)                        # (B, 2H)
        gh12 = jnp.dot(h12, whh, preferred_element_type=jnp.float32)   # (B, 6H)
        gh1 = gh12[:, :G3]
        gh2 = gh12[:, G3:]
        h1 = gru_cell(gi1, gh1, bhn1, h1)
        # gi2 needs the FRESH h1 -> stays a separate matmul.
        gi2 = jnp.dot(h1, wih2, preferred_element_type=jnp.float32) + bi2
        h2 = gru_cell(gi2, gh2, bhn2, h2)

    o_ref[...] = h2                                        # single output store


def _gru_forward_impl(hid, params, emb_dim):
    """Equivalent of GRU.forward: view -> 2-layer batch_first GRU -> out[:, -1, :]."""
    wih1, whh1, bih1, bhh1, wih2, whh2, bih2, bhh2 = params
    B = hid.shape[0]
    E = emb_dim
    x = hid.reshape(B, -1, E).astype(jnp.float32)          # (B, T, E)
    T = x.shape[1]
    H = whh1.shape[1]                                      # whh1 is (3H, H)
    G3 = 3 * H

    # Time-major, flattened. Tiny layout-plumbing op; fuses under jit.
    x_tm = jnp.transpose(x, (1, 0, 2)).reshape(T * B, E)

    wih1_t = wih1.T                                        # (E, 3H)
    wih2_t = wih2.T                                        # (H, 3H)

    # Block-diagonal recurrent weight -> one MXU op per step for gh1|gh2.
    whh_blk = jnp.zeros((2 * H, 2 * G3), jnp.float32)
    whh_blk = whh_blk.at[:H, :G3].set(whh1.T)
    whh_blk = whh_blk.at[H:, G3:].set(whh2.T)

    # Fold r/z slices of the hidden biases into the input biases (they only
    # ever appear as gi+gh). The n-gate hidden bias MUST stay separate (it is
    # multiplied by r inside the cell).
    zeros_h = jnp.zeros((H,), jnp.float32)
    bi1 = (bih1 + jnp.concatenate([bhh1[:2 * H], zeros_h])).reshape(1, G3)
    bi2 = (bih2 + jnp.concatenate([bhh2[:2 * H], zeros_h])).reshape(1, G3)
    bhn = jnp.concatenate([bhh1[2 * H:], bhh2[2 * H:]]).reshape(1, 2 * H)

    out = pl.pallas_call(
        gru_kernel,
        out_shape=jax.ShapeDtypeStruct((B, H), jnp.float32),
        grid_spec=pltpu.PrefetchScalarGridSpec(
            num_scalar_prefetch=0,
            grid=(1,),                        # whole recurrence, one invocation
            in_specs=[
                pl.BlockSpec((T * B, E), lambda i: (0, 0)),
                pl.BlockSpec((E, G3), lambda i: (0, 0)),
                pl.BlockSpec((1, G3), lambda i: (0, 0)),
                pl.BlockSpec((2 * H, 2 * G3), lambda i: (0, 0)),
                pl.BlockSpec((H, G3), lambda i: (0, 0)),
                pl.BlockSpec((1, G3), lambda i: (0, 0)),
                pl.BlockSpec((1, 2 * H), lambda i: (0, 0)),
            ],
            out_specs=pl.BlockSpec((B, H), lambda i: (0, 0)),
        ),
        compiler_params=pltpu.CompilerParams(
            dimension_semantics=("arbitrary",)),
    )(x_tm, wih1_t, bi1, whh_blk, wih2_t, bi2, bhn)
    return out


gru_forward = jax.jit(_gru_forward_impl, static_argnums=(2,))


def gru_reference(hid, params, emb_dim):
    """Pure-JAX reference matching torch.nn.GRU (2 layers, batch_first, dropout=0)."""
    wih1, whh1, bih1, bhh1, wih2, whh2, bih2, bhh2 = params
    B = hid.shape[0]
    x = hid.reshape(B, -1, emb_dim)
    H = whh1.shape[1]

    def cell(x_t, h_prev, wih, whh, bih, bhh):
        gi = x_t @ wih.T + bih
        gh = h_prev @ whh.T + bhh
        r = _sigmoid_exact(gi[:, :H] + gh[:, :H])
        z = _sigmoid_exact(gi[:, H:2 * H] + gh[:, H:2 * H])
        n = jnp.tanh(gi[:, 2 * H:] + r * gh[:, 2 * H:])
        return (1.0 - z) * n + z * h_prev

    def step(carry, x_t):
        h1, h2 = carry
        h1 = cell(x_t, h1, wih1, whh1, bih1, bhh1)
        h2 = cell(h1, h2, wih2, whh2, bih2, bhh2)
        return (h1, h2), h2

    h0 = (jnp.zeros((B, H), jnp.float32), jnp.zeros((B, H), jnp.float32))
    (_, h2_last), _ = jax.lax.scan(step, h0, jnp.transpose(x, (1, 0, 2)))
    return h2_last


def init_params(key, emb_dim, out_dim):
    """Deterministic init mimicking torch.nn.GRU: U(-1/sqrt(H), 1/sqrt(H))."""
    H, E = out_dim, emb_dim
    k = 1.0 / np.sqrt(H)
    keys = jax.random.split(key, 8)
    shapes = [(3 * H, E), (3 * H, H), (3 * H,), (3 * H,),
              (3 * H, H), (3 * H, H), (3 * H,), (3 * H,)]
    return tuple(
        jax.random.uniform(kk, s, jnp.float32, -k, k)
        for kk, s in zip(keys, shapes)
    )


if __name__ == "__main__":
    B, T, E, H = 4, 8, 32, 32     # batch, seq, emb_dim, out_dim
    key = jax.random.PRNGKey(0)
    k_x, k_p = jax.random.split(key)

    # Module input: anything that views to (B, -1, emb_dim); use (B, T*E).
    hid = jax.random.normal(k_x, (B, T * E), dtype=jnp.float32)
    params = init_params(k_p, E, H)

    out = gru_forward(hid, params, E)
    out = jax.block_until_ready(out)

    ref = gru_reference(hid, params, E)
    np.testing.assert_allclose(np.asarray(out), np.asarray(ref),
                               rtol=1e-5, atol=1e-5)
    assert out.shape == (B, H)
    print("KERNEL_OK")
</pallas_src>

<mosaic_0001>
module attributes {stable_mosaic.version = 11 : i64} {
  func.func @gru_kernel(%arg0: i32, %arg1: memref<32x32xf32, #tpu.memory_space<vmem>>, %arg2: memref<32x96xf32, #tpu.memory_space<vmem>>, %arg3: memref<1x96xf32, #tpu.memory_space<vmem>>, %arg4: memref<64x192xf32, #tpu.memory_space<vmem>>, %arg5: memref<32x96xf32, #tpu.memory_space<vmem>>, %arg6: memref<1x96xf32, #tpu.memory_space<vmem>>, %arg7: memref<1x64xf32, #tpu.memory_space<vmem>>, %arg8: memref<4x32xf32, #tpu.memory_space<vmem>>) attributes {dimension_semantics = [#tpu.dimension_semantics<arbitrary>], iteration_bounds = array<i64: 1>, scalar_prefetch = 0 : i64, scratch_operands = 0 : i64, tpu.core_type = #tpu.core_type<tc>, window_params = [{pipeline_mode = #tpu.pipeline_mode<synchronous>, transform_indices = @transform_0, window_bounds = array<i64: 32, 32>}, {pipeline_mode = #tpu.pipeline_mode<synchronous>, transform_indices = @transform_1, window_bounds = array<i64: 32, 96>}, {pipeline_mode = #tpu.pipeline_mode<synchronous>, transform_indices = @transform_2, window_bounds = array<i64: 1, 96>}, {pipeline_mode = #tpu.pipeline_mode<synchronous>, transform_indices = @transform_3, window_bounds = array<i64: 64, 192>}, {pipeline_mode = #tpu.pipeline_mode<synchronous>, transform_indices = @transform_4, window_bounds = array<i64: 32, 96>}, {pipeline_mode = #tpu.pipeline_mode<synchronous>, transform_indices = @transform_5, window_bounds = array<i64: 1, 96>}, {pipeline_mode = #tpu.pipeline_mode<synchronous>, transform_indices = @transform_6, window_bounds = array<i64: 1, 64>}, {pipeline_mode = #tpu.pipeline_mode<synchronous>, transform_indices = @transform_7, window_bounds = array<i64: 4, 32>}]} {
    %c0 = arith.constant 0 : index
    %c0_0 = arith.constant 0 : index
    %0 = vector.load %arg5[%c0, %c0_0] : memref<32x96xf32, #tpu.memory_space<vmem>>, vector<32x96xf32>
    %c0_1 = arith.constant 0 : index
    %c0_2 = arith.constant 0 : index
    %1 = vector.load %arg4[%c0_1, %c0_2] : memref<64x192xf32, #tpu.memory_space<vmem>>, vector<64x192xf32>
    %c0_3 = arith.constant 0 : index
    %c0_4 = arith.constant 0 : index
    %2 = vector.load %arg1[%c0_3, %c0_4] : memref<32x32xf32, #tpu.memory_space<vmem>>, vector<32x32xf32>
    %c0_5 = arith.constant 0 : index
    %c0_6 = arith.constant 0 : index
    %3 = vector.load %arg2[%c0_5, %c0_6] : memref<32x96xf32, #tpu.memory_space<vmem>>, vector<32x96xf32>
    %cst = arith.constant dense<0.000000e+00> : vector<32x96xf32>
    %4 = tpu.matmul %2, %3, %cst {dimension_numbers = #tpu.dot_dimension_numbers<[1], [0], [0], [1], [0, 0, 1, 1], [], []>} : vector<32x32xf32>, vector<32x96xf32>, vector<32x96xf32> -> vector<32x96xf32>
    %c0_7 = arith.constant 0 : index
    %c0_8 = arith.constant 0 : index
    %5 = vector.load %arg3[%c0_7, %c0_8] : memref<1x96xf32, #tpu.memory_space<vmem>>, vector<1x96xf32>
    %6 = vector.shape_cast %5 : vector<1x96xf32> to vector<1x96xf32>
    %7 = vector.broadcast %6 : vector<1x96xf32> to vector<32x96xf32>
    %8 = arith.addf %4, %7 : vector<32x96xf32>
    %c0_9 = arith.constant 0 : index
    %c0_10 = arith.constant 0 : index
    %9 = vector.load %arg6[%c0_9, %c0_10] : memref<1x96xf32, #tpu.memory_space<vmem>>, vector<1x96xf32>
    %10 = vector.shape_cast %9 : vector<1x96xf32> to vector<1x96xf32>
    %11 = vector.broadcast %10 : vector<1x96xf32> to vector<4x96xf32>
    %c0_11 = arith.constant 0 : index
    %c0_12 = arith.constant 0 : index
    %12 = vector.load %arg7[%c0_11, %c0_12] : memref<1x64xf32, #tpu.memory_space<vmem>>, vector<1x64xf32>
    %13 = vector.extract_strided_slice %12 {offsets = [0, 0], sizes = [1, 32], strides = [1, 1]} : vector<1x64xf32> to vector<1x32xf32>
    %14 = vector.shape_cast %13 : vector<1x32xf32> to vector<1x32xf32>
    %15 = vector.broadcast %14 : vector<1x32xf32> to vector<4x32xf32>
    %16 = vector.extract_strided_slice %12 {offsets = [0, 32], sizes = [1, 32], strides = [1, 1]} : vector<1x64xf32> to vector<1x32xf32>
    %17 = vector.shape_cast %16 : vector<1x32xf32> to vector<1x32xf32>
    %18 = vector.broadcast %17 : vector<1x32xf32> to vector<4x32xf32>
    %cst_13 = arith.constant 0.000000e+00 : f32
    %19 = vector.broadcast %cst_13 : f32 to vector<4x32xf32>
    %cst_14 = arith.constant 0.000000e+00 : f32
    %20 = vector.broadcast %cst_14 : f32 to vector<4x32xf32>
    %21 = vector.extract_strided_slice %8 {offsets = [0, 0], sizes = [4, 96], strides = [1, 1]} : vector<32x96xf32> to vector<4x96xf32>
    %22 = tpu.concatenate %19, %20 in 1 : vector<4x32xf32>, vector<4x32xf32> -> vector<4x64xf32>
    %cst_15 = arith.constant dense<0.000000e+00> : vector<4x192xf32>
    %23 = tpu.matmul %22, %1, %cst_15 {dimension_numbers = #tpu.dot_dimension_numbers<[1], [0], [0], [1], [0, 0, 1, 1], [], []>} : vector<4x64xf32>, vector<64x192xf32>, vector<4x192xf32> -> vector<4x192xf32>
    %24 = vector.extract_strided_slice %23 {offsets = [0, 0], sizes = [4, 96], strides = [1, 1]} : vector<4x192xf32> to vector<4x96xf32>
    %25 = vector.extract_strided_slice %23 {offsets = [0, 96], sizes = [4, 96], strides = [1, 1]} : vector<4x192xf32> to vector<4x96xf32>
    %26 = vector.extract_strided_slice %21 {offsets = [0, 0], sizes = [4, 64], strides = [1, 1]} : vector<4x96xf32> to vector<4x64xf32>
    %27 = vector.extract_strided_slice %24 {offsets = [0, 0], sizes = [4, 64], strides = [1, 1]} : vector<4x96xf32> to vector<4x64xf32>
    %28 = arith.addf %26, %27 : vector<4x64xf32>
    %cst_16 = arith.constant 5.000000e-01 : f32
    %29 = vector.broadcast %cst_16 : f32 to vector<4x64xf32>
    %30 = arith.mulf %29, %28 : vector<4x64xf32>
    %31 = math.tanh %30 : vector<4x64xf32>
    %cst_17 = arith.constant 1.000000e+00 : f32
    %32 = vector.broadcast %cst_17 : f32 to vector<4x64xf32>
    %33 = arith.addf %31, %32 : vector<4x64xf32>
    %cst_18 = arith.constant 5.000000e-01 : f32
    %34 = vector.broadcast %cst_18 : f32 to vector<4x64xf32>
    %35 = arith.mulf %34, %33 : vector<4x64xf32>
    %36 = vector.extract_strided_slice %35 {offsets = [0, 0], sizes = [4, 32], strides = [1, 1]} : vector<4x64xf32> to vector<4x32xf32>
    %37 = vector.extract_strided_slice %35 {offsets = [0, 32], sizes = [4, 32], strides = [1, 1]} : vector<4x64xf32> to vector<4x32xf32>
    %38 = vector.extract_strided_slice %21 {offsets = [0, 64], sizes = [4, 32], strides = [1, 1]} : vector<4x96xf32> to vector<4x32xf32>
    %39 = vector.extract_strided_slice %24 {offsets = [0, 64], sizes = [4, 32], strides = [1, 1]} : vector<4x96xf32> to vector<4x32xf32>
    %40 = arith.addf %39, %15 : vector<4x32xf32>
    %41 = arith.mulf %36, %40 : vector<4x32xf32>
    %42 = arith.addf %38, %41 : vector<4x32xf32>
    %43 = math.tanh %42 : vector<4x32xf32>
    %cst_19 = arith.constant 1.000000e+00 : f32
    %44 = vector.broadcast %cst_19 : f32 to vector<4x32xf32>
    %45 = arith.subf %44, %37 : vector<4x32xf32>
    %46 = arith.mulf %45, %43 : vector<4x32xf32>
    %47 = arith.mulf %37, %19 : vector<4x32xf32>
    %48 = arith.addf %46, %47 : vector<4x32xf32>
    %cst_20 = arith.constant dense<0.000000e+00> : vector<4x96xf32>
    %49 = tpu.matmul %48, %0, %cst_20 {dimension_numbers = #tpu.dot_dimension_numbers<[1], [0], [0], [1], [0, 0, 1, 1], [], []>} : vector<4x32xf32>, vector<32x96xf32>, vector<4x96xf32> -> vector<4x96xf32>
    %50 = arith.addf %49, %11 : vector<4x96xf32>
    %51 = vector.extract_strided_slice %50 {offsets = [0, 0], sizes = [4, 64], strides = [1, 1]} : vector<4x96xf32> to vector<4x64xf32>
    %52 = vector.extract_strided_slice %25 {offsets = [0, 0], sizes = [4, 64], strides = [1, 1]} : vector<4x96xf32> to vector<4x64xf32>
    %53 = arith.addf %51, %52 : vector<4x64xf32>
    %cst_21 = arith.constant 5.000000e-01 : f32
    %54 = vector.broadcast %cst_21 : f32 to vector<4x64xf32>
    %55 = arith.mulf %54, %53 : vector<4x64xf32>
    %56 = math.tanh %55 : vector<4x64xf32>
    %cst_22 = arith.constant 1.000000e+00 : f32
    %57 = vector.broadcast %cst_22 : f32 to vector<4x64xf32>
    %58 = arith.addf %56, %57 : vector<4x64xf32>
    %cst_23 = arith.constant 5.000000e-01 : f32
    %59 = vector.broadcast %cst_23 : f32 to vector<4x64xf32>
    %60 = arith.mulf %59, %58 : vector<4x64xf32>
    %61 = vector.extract_strided_slice %60 {offsets = [0, 0], sizes = [4, 32], strides = [1, 1]} : vector<4x64xf32> to vector<4x32xf32>
    %62 = vector.extract_strided_slice %60 {offsets = [0, 32], sizes = [4, 32], strides = [1, 1]} : vector<4x64xf32> to vector<4x32xf32>
    %63 = vector.extract_strided_slice %50 {offsets = [0, 64], sizes = [4, 32], strides = [1, 1]} : vector<4x96xf32> to vector<4x32xf32>
    %64 = vector.extract_strided_slice %25 {offsets = [0, 64], sizes = [4, 32], strides = [1, 1]} : vector<4x96xf32> to vector<4x32xf32>
    %65 = arith.addf %64, %18 : vector<4x32xf32>
    %66 = arith.mulf %61, %65 : vector<4x32xf32>
    %67 = arith.addf %63, %66 : vector<4x32xf32>
    %68 = math.tanh %67 : vector<4x32xf32>
    %cst_24 = arith.constant 1.000000e+00 : f32
    %69 = vector.broadcast %cst_24 : f32 to vector<4x32xf32>
    %70 = arith.subf %69, %62 : vector<4x32xf32>
    %71 = arith.mulf %70, %68 : vector<4x32xf32>
    %72 = arith.mulf %62, %20 : vector<4x32xf32>
    %73 = arith.addf %71, %72 : vector<4x32xf32>
    %74 = vector.extract_strided_slice %8 {offsets = [4, 0], sizes = [4, 96], strides = [1, 1]} : vector<32x96xf32> to vector<4x96xf32>
    %75 = tpu.concatenate %48, %73 in 1 : vector<4x32xf32>, vector<4x32xf32> -> vector<4x64xf32>
    %cst_25 = arith.constant dense<0.000000e+00> : vector<4x192xf32>
    %76 = tpu.matmul %75, %1, %cst_25 {dimension_numbers = #tpu.dot_dimension_numbers<[1], [0], [0], [1], [0, 0, 1, 1], [], []>} : vector<4x64xf32>, vector<64x192xf32>, vector<4x192xf32> -> vector<4x192xf32>
    %77 = vector.extract_strided_slice %76 {offsets = [0, 0], sizes = [4, 96], strides = [1, 1]} : vector<4x192xf32> to vector<4x96xf32>
    %78 = vector.extract_strided_slice %76 {offsets = [0, 96], sizes = [4, 96], strides = [1, 1]} : vector<4x192xf32> to vector<4x96xf32>
    %79 = vector.extract_strided_slice %74 {offsets = [0, 0], sizes = [4, 64], strides = [1, 1]} : vector<4x96xf32> to vector<4x64xf32>
    %80 = vector.extract_strided_slice %77 {offsets = [0, 0], sizes = [4, 64], strides = [1, 1]} : vector<4x96xf32> to vector<4x64xf32>
    %81 = arith.addf %79, %80 : vector<4x64xf32>
    %cst_26 = arith.constant 5.000000e-01 : f32
    %82 = vector.broadcast %cst_26 : f32 to vector<4x64xf32>
    %83 = arith.mulf %82, %81 : vector<4x64xf32>
    %84 = math.tanh %83 : vector<4x64xf32>
    %cst_27 = arith.constant 1.000000e+00 : f32
    %85 = vector.broadcast %cst_27 : f32 to vector<4x64xf32>
    %86 = arith.addf %84, %85 : vector<4x64xf32>
    %cst_28 = arith.constant 5.000000e-01 : f32
    %87 = vector.broadcast %cst_28 : f32 to vector<4x64xf32>
    %88 = arith.mulf %87, %86 : vector<4x64xf32>
    %89 = vector.extract_strided_slice %88 {offsets = [0, 0], sizes = [4, 32], strides = [1, 1]} : vector<4x64xf32> to vector<4x32xf32>
    %90 = vector.extract_strided_slice %88 {offsets = [0, 32], sizes = [4, 32], strides = [1, 1]} : vector<4x64xf32> to vector<4x32xf32>
    %91 = vector.extract_strided_slice %74 {offsets = [0, 64], sizes = [4, 32], strides = [1, 1]} : vector<4x96xf32> to vector<4x32xf32>
    %92 = vector.extract_strided_slice %77 {offsets = [0, 64], sizes = [4, 32], strides = [1, 1]} : vector<4x96xf32> to vector<4x32xf32>
    %93 = arith.addf %92, %15 : vector<4x32xf32>
    %94 = arith.mulf %89, %93 : vector<4x32xf32>
    %95 = arith.addf %91, %94 : vector<4x32xf32>
    %96 = math.tanh %95 : vector<4x32xf32>
    %cst_29 = arith.constant 1.000000e+00 : f32
    %97 = vector.broadcast %cst_29 : f32 to vector<4x32xf32>
    %98 = arith.subf %97, %90 : vector<4x32xf32>
    %99 = arith.mulf %98, %96 : vector<4x32xf32>
    %100 = arith.mulf %90, %48 : vector<4x32xf32>
    %101 = arith.addf %99, %100 : vector<4x32xf32>
    %cst_30 = arith.constant dense<0.000000e+00> : vector<4x96xf32>
    %102 = tpu.matmul %101, %0, %cst_30 {dimension_numbers = #tpu.dot_dimension_numbers<[1], [0], [0], [1], [0, 0, 1, 1], [], []>} : vector<4x32xf32>, vector<32x96xf32>, vector<4x96xf32> -> vector<4x96xf32>
    %103 = arith.addf %102, %11 : vector<4x96xf32>
    %104 = vector.extract_strided_slice %103 {offsets = [0, 0], sizes = [4, 64], strides = [1, 1]} : vector<4x96xf32> to vector<4x64xf32>
    %105 = vector.extract_strided_slice %78 {offsets = [0, 0], sizes = [4, 64], strides = [1, 1]} : vector<4x96xf32> to vector<4x64xf32>
    %106 = arith.addf %104, %105 : vector<4x64xf32>
    %cst_31 = arith.constant 5.000000e-01 : f32
    %107 = vector.broadcast %cst_31 : f32 to vector<4x64xf32>
    %108 = arith.mulf %107, %106 : vector<4x64xf32>
    %109 = math.tanh %108 : vector<4x64xf32>
    %cst_32 = arith.constant 1.000000e+00 : f32
    %110 = vector.broadcast %cst_32 : f32 to vector<4x64xf32>
    %111 = arith.addf %109, %110 : vector<4x64xf32>
    %cst_33 = arith.constant 5.000000e-01 : f32
    %112 = vector.broadcast %cst_33 : f32 to vector<4x64xf32>
    %113 = arith.mulf %112, %111 : vector<4x64xf32>
    %114 = vector.extract_strided_slice %113 {offsets = [0, 0], sizes = [4, 32], strides = [1, 1]} : vector<4x64xf32> to vector<4x32xf32>
    %115 = vector.extract_strided_slice %113 {offsets = [0, 32], sizes = [4, 32], strides = [1, 1]} : vector<4x64xf32> to vector<4x32xf32>
    %116 = vector.extract_strided_slice %103 {offsets = [0, 64], sizes = [4, 32], strides = [1, 1]} : vector<4x96xf32> to vector<4x32xf32>
    %117 = vector.extract_strided_slice %78 {offsets = [0, 64], sizes = [4, 32], strides = [1, 1]} : vector<4x96xf32> to vector<4x32xf32>
    %118 = arith.addf %117, %18 : vector<4x32xf32>
    %119 = arith.mulf %114, %118 : vector<4x32xf32>
    %120 = arith.addf %116, %119 : vector<4x32xf32>
    %121 = math.tanh %120 : vector<4x32xf32>
    %cst_34 = arith.constant 1.000000e+00 : f32
    %122 = vector.broadcast %cst_34 : f32 to vector<4x32xf32>
    %123 = arith.subf %122, %115 : vector<4x32xf32>
    %124 = arith.mulf %123, %121 : vector<4x32xf32>
    %125 = arith.mulf %115, %73 : vector<4x32xf32>
    %126 = arith.addf %124, %125 : vector<4x32xf32>
    %127 = vector.extract_strided_slice %8 {offsets = [8, 0], sizes = [4, 96], strides = [1, 1]} : vector<32x96xf32> to vector<4x96xf32>
    %128 = tpu.concatenate %101, %126 in 1 : vector<4x32xf32>, vector<4x32xf32> -> vector<4x64xf32>
    %cst_35 = arith.constant dense<0.000000e+00> : vector<4x192xf32>
    %129 = tpu.matmul %128, %1, %cst_35 {dimension_numbers = #tpu.dot_dimension_numbers<[1], [0], [0], [1], [0, 0, 1, 1], [], []>} : vector<4x64xf32>, vector<64x192xf32>, vector<4x192xf32> -> vector<4x192xf32>
    %130 = vector.extract_strided_slice %129 {offsets = [0, 0], sizes = [4, 96], strides = [1, 1]} : vector<4x192xf32> to vector<4x96xf32>
    %131 = vector.extract_strided_slice %129 {offsets = [0, 96], sizes = [4, 96], strides = [1, 1]} : vector<4x192xf32> to vector<4x96xf32>
    %132 = vector.extract_strided_slice %127 {offsets = [0, 0], sizes = [4, 64], strides = [1, 1]} : vector<4x96xf32> to vector<4x64xf32>
    %133 = vector.extract_strided_slice %130 {offsets = [0, 0], sizes = [4, 64], strides = [1, 1]} : vector<4x96xf32> to vector<4x64xf32>
    %134 = arith.addf %132, %133 : vector<4x64xf32>
    %cst_36 = arith.constant 5.000000e-01 : f32
    %135 = vector.broadcast %cst_36 : f32 to vector<4x64xf32>
    %136 = arith.mulf %135, %134 : vector<4x64xf32>
    %137 = math.tanh %136 : vector<4x64xf32>
    %cst_37 = arith.constant 1.000000e+00 : f32
    %138 = vector.broadcast %cst_37 : f32 to vector<4x64xf32>
    %139 = arith.addf %137, %138 : vector<4x64xf32>
    %cst_38 = arith.constant 5.000000e-01 : f32
    %140 = vector.broadcast %cst_38 : f32 to vector<4x64xf32>
    %141 = arith.mulf %140, %139 : vector<4x64xf32>
    %142 = vector.extract_strided_slice %141 {offsets = [0, 0], sizes = [4, 32], strides = [1, 1]} : vector<4x64xf32> to vector<4x32xf32>
    %143 = vector.extract_strided_slice %141 {offsets = [0, 32], sizes = [4, 32], strides = [1, 1]} : vector<4x64xf32> to vector<4x32xf32>
    %144 = vector.extract_strided_slice %127 {offsets = [0, 64], sizes = [4, 32], strides = [1, 1]} : vector<4x96xf32> to vector<4x32xf32>
    %145 = vector.extract_strided_slice %130 {offsets = [0, 64], sizes = [4, 32], strides = [1, 1]} : vector<4x96xf32> to vector<4x32xf32>
    %146 = arith.addf %145, %15 : vector<4x32xf32>
    %147 = arith.mulf %142, %146 : vector<4x32xf32>
    %148 = arith.addf %144, %147 : vector<4x32xf32>
    %149 = math.tanh %148 : vector<4x32xf32>
    %cst_39 = arith.constant 1.000000e+00 : f32
    %150 = vector.broadcast %cst_39 : f32 to vector<4x32xf32>
    %151 = arith.subf %150, %143 : vector<4x32xf32>
    %152 = arith.mulf %151, %149 : vector<4x32xf32>
    %153 = arith.mulf %143, %101 : vector<4x32xf32>
    %154 = arith.addf %152, %153 : vector<4x32xf32>
    %cst_40 = arith.constant dense<0.000000e+00> : vector<4x96xf32>
    %155 = tpu.matmul %154, %0, %cst_40 {dimension_numbers = #tpu.dot_dimension_numbers<[1], [0], [0], [1], [0, 0, 1, 1], [], []>} : vector<4x32xf32>, vector<32x96xf32>, vector<4x96xf32> -> vector<4x96xf32>
    %156 = arith.addf %155, %11 : vector<4x96xf32>
    %157 = vector.extract_strided_slice %156 {offsets = [0, 0], sizes = [4, 64], strides = [1, 1]} : vector<4x96xf32> to vector<4x64xf32>
    %158 = vector.extract_strided_slice %131 {offsets = [0, 0], sizes = [4, 64], strides = [1, 1]} : vector<4x96xf32> to vector<4x64xf32>
    %159 = arith.addf %157, %158 : vector<4x64xf32>
    %cst_41 = arith.constant 5.000000e-01 : f32
    %160 = vector.broadcast %cst_41 : f32 to vector<4x64xf32>
    %161 = arith.mulf %160, %159 : vector<4x64xf32>
    %162 = math.tanh %161 : vector<4x64xf32>
    %cst_42 = arith.constant 1.000000e+00 : f32
    %163 = vector.broadcast %cst_42 : f32 to vector<4x64xf32>
    %164 = arith.addf %162, %163 : vector<4x64xf32>
    %cst_43 = arith.constant 5.000000e-01 : f32
    %165 = vector.broadcast %cst_43 : f32 to vector<4x64xf32>
    %166 = arith.mulf %165, %164 : vector<4x64xf32>
    %167 = vector.extract_strided_slice %166 {offsets = [0, 0], sizes = [4, 32], strides = [1, 1]} : vector<4x64xf32> to vector<4x32xf32>
    %168 = vector.extract_strided_slice %166 {offsets = [0, 32], sizes = [4, 32], strides = [1, 1]} : vector<4x64xf32> to vector<4x32xf32>
    %169 = vector.extract_strided_slice %156 {offsets = [0, 64], sizes = [4, 32], strides = [1, 1]} : vector<4x96xf32> to vector<4x32xf32>
    %170 = vector.extract_strided_slice %131 {offsets = [0, 64], sizes = [4, 32], strides = [1, 1]} : vector<4x96xf32> to vector<4x32xf32>
    %171 = arith.addf %170, %18 : vector<4x32xf32>
    %172 = arith.mulf %167, %171 : vector<4x32xf32>
    %173 = arith.addf %169, %172 : vector<4x32xf32>
    %174 = math.tanh %173 : vector<4x32xf32>
    %cst_44 = arith.constant 1.000000e+00 : f32
    %175 = vector.broadcast %cst_44 : f32 to vector<4x32xf32>
    %176 = arith.subf %175, %168 : vector<4x32xf32>
    %177 = arith.mulf %176, %174 : vector<4x32xf32>
    %178 = arith.mulf %168, %126 : vector<4x32xf32>
    %179 = arith.addf %177, %178 : vector<4x32xf32>
    %180 = vector.extract_strided_slice %8 {offsets = [12, 0], sizes = [4, 96], strides = [1, 1]} : vector<32x96xf32> to vector<4x96xf32>
    %181 = tpu.concatenate %154, %179 in 1 : vector<4x32xf32>, vector<4x32xf32> -> vector<4x64xf32>
    %cst_45 = arith.constant dense<0.000000e+00> : vector<4x192xf32>
    %182 = tpu.matmul %181, %1, %cst_45 {dimension_numbers = #tpu.dot_dimension_numbers<[1], [0], [0], [1], [0, 0, 1, 1], [], []>} : vector<4x64xf32>, vector<64x192xf32>, vector<4x192xf32> -> vector<4x192xf32>
    %183 = vector.extract_strided_slice %182 {offsets = [0, 0], sizes = [4, 96], strides = [1, 1]} : vector<4x192xf32> to vector<4x96xf32>
    %184 = vector.extract_strided_slice %182 {offsets = [0, 96], sizes = [4, 96], strides = [1, 1]} : vector<4x192xf32> to vector<4x96xf32>
    %185 = vector.extract_strided_slice %180 {offsets = [0, 0], sizes = [4, 64], strides = [1, 1]} : vector<4x96xf32> to vector<4x64xf32>
    %186 = vector.extract_strided_slice %183 {offsets = [0, 0], sizes = [4, 64], strides = [1, 1]} : vector<4x96xf32> to vector<4x64xf32>
    %187 = arith.addf %185, %186 : vector<4x64xf32>
    %cst_46 = arith.constant 5.000000e-01 : f32
    %188 = vector.broadcast %cst_46 : f32 to vector<4x64xf32>
    %189 = arith.mulf %188, %187 : vector<4x64xf32>
    %190 = math.tanh %189 : vector<4x64xf32>
    %cst_47 = arith.constant 1.000000e+00 : f32
    %191 = vector.broadcast %cst_47 : f32 to vector<4x64xf32>
    %192 = arith.addf %190, %191 : vector<4x64xf32>
    %cst_48 = arith.constant 5.000000e-01 : f32
    %193 = vector.broadcast %cst_48 : f32 to vector<4x64xf32>
    %194 = arith.mulf %193, %192 : vector<4x64xf32>
    %195 = vector.extract_strided_slice %194 {offsets = [0, 0], sizes = [4, 32], strides = [1, 1]} : vector<4x64xf32> to vector<4x32xf32>
    %196 = vector.extract_strided_slice %194 {offsets = [0, 32], sizes = [4, 32], strides = [1, 1]} : vector<4x64xf32> to vector<4x32xf32>
    %197 = vector.extract_strided_slice %180 {offsets = [0, 64], sizes = [4, 32], strides = [1, 1]} : vector<4x96xf32> to vector<4x32xf32>
    %198 = vector.extract_strided_slice %183 {offsets = [0, 64], sizes = [4, 32], strides = [1, 1]} : vector<4x96xf32> to vector<4x32xf32>
    %199 = arith.addf %198, %15 : vector<4x32xf32>
    %200 = arith.mulf %195, %199 : vector<4x32xf32>
    %201 = arith.addf %197, %200 : vector<4x32xf32>
    %202 = math.tanh %201 : vector<4x32xf32>
    %cst_49 = arith.constant 1.000000e+00 : f32
    %203 = vector.broadcast %cst_49 : f32 to vector<4x32xf32>
    %204 = arith.subf %203, %196 : vector<4x32xf32>
    %205 = arith.mulf %204, %202 : vector<4x32xf32>
    %206 = arith.mulf %196, %154 : vector<4x32xf32>
    %207 = arith.addf %205, %206 : vector<4x32xf32>
    %cst_50 = arith.constant dense<0.000000e+00> : vector<4x96xf32>
    %208 = tpu.matmul %207, %0, %cst_50 {dimension_numbers = #tpu.dot_dimension_numbers<[1], [0], [0], [1], [0, 0, 1, 1], [], []>} : vector<4x32xf32>, vector<32x96xf32>, vector<4x96xf32> -> vector<4x96xf32>
    %209 = arith.addf %208, %11 : vector<4x96xf32>
    %210 = vector.extract_strided_slice %209 {offsets = [0, 0], sizes = [4, 64], strides = [1, 1]} : vector<4x96xf32> to vector<4x64xf32>
    %211 = vector.extract_strided_slice %184 {offsets = [0, 0], sizes = [4, 64], strides = [1, 1]} : vector<4x96xf32> to vector<4x64xf32>
    %212 = arith.addf %210, %211 : vector<4x64xf32>
    %cst_51 = arith.constant 5.000000e-01 : f32
    %213 = vector.broadcast %cst_51 : f32 to vector<4x64xf32>
    %214 = arith.mulf %213, %212 : vector<4x64xf32>
    %215 = math.tanh %214 : vector<4x64xf32>
    %cst_52 = arith.constant 1.000000e+00 : f32
    %216 = vector.broadcast %cst_52 : f32 to vector<4x64xf32>
    %217 = arith.addf %215, %216 : vector<4x64xf32>
    %cst_53 = arith.constant 5.000000e-01 : f32
    %218 = vector.broadcast %cst_53 : f32 to vector<4x64xf32>
    %219 = arith.mulf %218, %217 : vector<4x64xf32>
    %220 = vector.extract_strided_slice %219 {offsets = [0, 0], sizes = [4, 32], strides = [1, 1]} : vector<4x64xf32> to vector<4x32xf32>
    %221 = vector.extract_strided_slice %219 {offsets = [0, 32], sizes = [4, 32], strides = [1, 1]} : vector<4x64xf32> to vector<4x32xf32>
    %222 = vector.extract_strided_slice %209 {offsets = [0, 64], sizes = [4, 32], strides = [1, 1]} : vector<4x96xf32> to vector<4x32xf32>
    %223 = vector.extract_strided_slice %184 {offsets = [0, 64], sizes = [4, 32], strides = [1, 1]} : vector<4x96xf32> to vector<4x32xf32>
    %224 = arith.addf %223, %18 : vector<4x32xf32>
    %225 = arith.mulf %220, %224 : vector<4x32xf32>
    %226 = arith.addf %222, %225 : vector<4x32xf32>
    %227 = math.tanh %226 : vector<4x32xf32>
    %cst_54 = arith.constant 1.000000e+00 : f32
    %228 = vector.broadcast %cst_54 : f32 to vector<4x32xf32>
    %229 = arith.subf %228, %221 : vector<4x32xf32>
    %230 = arith.mulf %229, %227 : vector<4x32xf32>
    %231 = arith.mulf %221, %179 : vector<4x32xf32>
    %232 = arith.addf %230, %231 : vector<4x32xf32>
    %233 = vector.extract_strided_slice %8 {offsets = [16, 0], sizes = [4, 96], strides = [1, 1]} : vector<32x96xf32> to vector<4x96xf32>
    %234 = tpu.concatenate %207, %232 in 1 : vector<4x32xf32>, vector<4x32xf32> -> vector<4x64xf32>
    %cst_55 = arith.constant dense<0.000000e+00> : vector<4x192xf32>
    %235 = tpu.matmul %234, %1, %cst_55 {dimension_numbers = #tpu.dot_dimension_numbers<[1], [0], [0], [1], [0, 0, 1, 1], [], []>} : vector<4x64xf32>, vector<64x192xf32>, vector<4x192xf32> -> vector<4x192xf32>
    %236 = vector.extract_strided_slice %235 {offsets = [0, 0], sizes = [4, 96], strides = [1, 1]} : vector<4x192xf32> to vector<4x96xf32>
    %237 = vector.extract_strided_slice %235 {offsets = [0, 96], sizes = [4, 96], strides = [1, 1]} : vector<4x192xf32> to vector<4x96xf32>
    %238 = vector.extract_strided_slice %233 {offsets = [0, 0], sizes = [4, 64], strides = [1, 1]} : vector<4x96xf32> to vector<4x64xf32>
    %239 = vector.extract_strided_slice %236 {offsets = [0, 0], sizes = [4, 64], strides = [1, 1]} : vector<4x96xf32> to vector<4x64xf32>
    %240 = arith.addf %238, %239 : vector<4x64xf32>
    %cst_56 = arith.constant 5.000000e-01 : f32
    %241 = vector.broadcast %cst_56 : f32 to vector<4x64xf32>
    %242 = arith.mulf %241, %240 : vector<4x64xf32>
    %243 = math.tanh %242 : vector<4x64xf32>
    %cst_57 = arith.constant 1.000000e+00 : f32
    %244 = vector.broadcast %cst_57 : f32 to vector<4x64xf32>
    %245 = arith.addf %243, %244 : vector<4x64xf32>
    %cst_58 = arith.constant 5.000000e-01 : f32
    %246 = vector.broadcast %cst_58 : f32 to vector<4x64xf32>
    %247 = arith.mulf %246, %245 : vector<4x64xf32>
    %248 = vector.extract_strided_slice %247 {offsets = [0, 0], sizes = [4, 32], strides = [1, 1]} : vector<4x64xf32> to vector<4x32xf32>
    %249 = vector.extract_strided_slice %247 {offsets = [0, 32], sizes = [4, 32], strides = [1, 1]} : vector<4x64xf32> to vector<4x32xf32>
    %250 = vector.extract_strided_slice %233 {offsets = [0, 64], sizes = [4, 32], strides = [1, 1]} : vector<4x96xf32> to vector<4x32xf32>
    %251 = vector.extract_strided_slice %236 {offsets = [0, 64], sizes = [4, 32], strides = [1, 1]} : vector<4x96xf32> to vector<4x32xf32>
    %252 = arith.addf %251, %15 : vector<4x32xf32>
    %253 = arith.mulf %248, %252 : vector<4x32xf32>
    %254 = arith.addf %250, %253 : vector<4x32xf32>
    %255 = math.tanh %254 : vector<4x32xf32>
    %cst_59 = arith.constant 1.000000e+00 : f32
    %256 = vector.broadcast %cst_59 : f32 to vector<4x32xf32>
    %257 = arith.subf %256, %249 : vector<4x32xf32>
    %258 = arith.mulf %257, %255 : vector<4x32xf32>
    %259 = arith.mulf %249, %207 : vector<4x32xf32>
    %260 = arith.addf %258, %259 : vector<4x32xf32>
    %cst_60 = arith.constant dense<0.000000e+00> : vector<4x96xf32>
    %261 = tpu.matmul %260, %0, %cst_60 {dimension_numbers = #tpu.dot_dimension_numbers<[1], [0], [0], [1], [0, 0, 1, 1], [], []>} : vector<4x32xf32>, vector<32x96xf32>, vector<4x96xf32> -> vector<4x96xf32>
    %262 = arith.addf %261, %11 : vector<4x96xf32>
    %263 = vector.extract_strided_slice %262 {offsets = [0, 0], sizes = [4, 64], strides = [1, 1]} : vector<4x96xf32> to vector<4x64xf32>
    %264 = vector.extract_strided_slice %237 {offsets = [0, 0], sizes = [4, 64], strides = [1, 1]} : vector<4x96xf32> to vector<4x64xf32>
    %265 = arith.addf %263, %264 : vector<4x64xf32>
    %cst_61 = arith.constant 5.000000e-01 : f32
    %266 = vector.broadcast %cst_61 : f32 to vector<4x64xf32>
    %267 = arith.mulf %266, %265 : vector<4x64xf32>
    %268 = math.tanh %267 : vector<4x64xf32>
    %cst_62 = arith.constant 1.000000e+00 : f32
    %269 = vector.broadcast %cst_62 : f32 to vector<4x64xf32>
    %270 = arith.addf %268, %269 : vector<4x64xf32>
    %cst_63 = arith.constant 5.000000e-01 : f32
    %271 = vector.broadcast %cst_63 : f32 to vector<4x64xf32>
    %272 = arith.mulf %271, %270 : vector<4x64xf32>
    %273 = vector.extract_strided_slice %272 {offsets = [0, 0], sizes = [4, 32], strides = [1, 1]} : vector<4x64xf32> to vector<4x32xf32>
    %274 = vector.extract_strided_slice %272 {offsets = [0, 32], sizes = [4, 32], strides = [1, 1]} : vector<4x64xf32> to vector<4x32xf32>
    %275 = vector.extract_strided_slice %262 {offsets = [0, 64], sizes = [4, 32], strides = [1, 1]} : vector<4x96xf32> to vector<4x32xf32>
    %276 = vector.extract_strided_slice %237 {offsets = [0, 64], sizes = [4, 32], strides = [1, 1]} : vector<4x96xf32> to vector<4x32xf32>
    %277 = arith.addf %276, %18 : vector<4x32xf32>
    %278 = arith.mulf %273, %277 : vector<4x32xf32>
    %279 = arith.addf %275, %278 : vector<4x32xf32>
    %280 = math.tanh %279 : vector<4x32xf32>
    %cst_64 = arith.constant 1.000000e+00 : f32
    %281 = vector.broadcast %cst_64 : f32 to vector<4x32xf32>
    %282 = arith.subf %281, %274 : vector<4x32xf32>
    %283 = arith.mulf %282, %280 : vector<4x32xf32>
    %284 = arith.mulf %274, %232 : vector<4x32xf32>
    %285 = arith.addf %283, %284 : vector<4x32xf32>
    %286 = vector.extract_strided_slice %8 {offsets = [20, 0], sizes = [4, 96], strides = [1, 1]} : vector<32x96xf32> to vector<4x96xf32>
    %287 = tpu.concatenate %260, %285 in 1 : vector<4x32xf32>, vector<4x32xf32> -> vector<4x64xf32>
    %cst_65 = arith.constant dense<0.000000e+00> : vector<4x192xf32>
    %288 = tpu.matmul %287, %1, %cst_65 {dimension_numbers = #tpu.dot_dimension_numbers<[1], [0], [0], [1], [0, 0, 1, 1], [], []>} : vector<4x64xf32>, vector<64x192xf32>, vector<4x192xf32> -> vector<4x192xf32>
    %289 = vector.extract_strided_slice %288 {offsets = [0, 0], sizes = [4, 96], strides = [1, 1]} : vector<4x192xf32> to vector<4x96xf32>
    %290 = vector.extract_strided_slice %288 {offsets = [0, 96], sizes = [4, 96], strides = [1, 1]} : vector<4x192xf32> to vector<4x96xf32>
    %291 = vector.extract_strided_slice %286 {offsets = [0, 0], sizes = [4, 64], strides = [1, 1]} : vector<4x96xf32> to vector<4x64xf32>
    %292 = vector.extract_strided_slice %289 {offsets = [0, 0], sizes = [4, 64], strides = [1, 1]} : vector<4x96xf32> to vector<4x64xf32>
    %293 = arith.addf %291, %292 : vector<4x64xf32>
    %cst_66 = arith.constant 5.000000e-01 : f32
    %294 = vector.broadcast %cst_66 : f32 to vector<4x64xf32>
    %295 = arith.mulf %294, %293 : vector<4x64xf32>
    %296 = math.tanh %295 : vector<4x64xf32>
    %cst_67 = arith.constant 1.000000e+00 : f32
    %297 = vector.broadcast %cst_67 : f32 to vector<4x64xf32>
    %298 = arith.addf %296, %297 : vector<4x64xf32>
    %cst_68 = arith.constant 5.000000e-01 : f32
    %299 = vector.broadcast %cst_68 : f32 to vector<4x64xf32>
    %300 = arith.mulf %299, %298 : vector<4x64xf32>
    %301 = vector.extract_strided_slice %300 {offsets = [0, 0], sizes = [4, 32], strides = [1, 1]} : vector<4x64xf32> to vector<4x32xf32>
    %302 = vector.extract_strided_slice %300 {offsets = [0, 32], sizes = [4, 32], strides = [1, 1]} : vector<4x64xf32> to vector<4x32xf32>
    %303 = vector.extract_strided_slice %286 {offsets = [0, 64], sizes = [4, 32], strides = [1, 1]} : vector<4x96xf32> to vector<4x32xf32>
    %304 = vector.extract_strided_slice %289 {offsets = [0, 64], sizes = [4, 32], strides = [1, 1]} : vector<4x96xf32> to vector<4x32xf32>
    %305 = arith.addf %304, %15 : vector<4x32xf32>
    %306 = arith.mulf %301, %305 : vector<4x32xf32>
    %307 = arith.addf %303, %306 : vector<4x32xf32>
    %308 = math.tanh %307 : vector<4x32xf32>
    %cst_69 = arith.constant 1.000000e+00 : f32
    %309 = vector.broadcast %cst_69 : f32 to vector<4x32xf32>
    %310 = arith.subf %309, %302 : vector<4x32xf32>
    %311 = arith.mulf %310, %308 : vector<4x32xf32>
    %312 = arith.mulf %302, %260 : vector<4x32xf32>
    %313 = arith.addf %311, %312 : vector<4x32xf32>
    %cst_70 = arith.constant dense<0.000000e+00> : vector<4x96xf32>
    %314 = tpu.matmul %313, %0, %cst_70 {dimension_numbers = #tpu.dot_dimension_numbers<[1], [0], [0], [1], [0, 0, 1, 1], [], []>} : vector<4x32xf32>, vector<32x96xf32>, vector<4x96xf32> -> vector<4x96xf32>
    %315 = arith.addf %314, %11 : vector<4x96xf32>
    %316 = vector.extract_strided_slice %315 {offsets = [0, 0], sizes = [4, 64], strides = [1, 1]} : vector<4x96xf32> to vector<4x64xf32>
    %317 = vector.extract_strided_slice %290 {offsets = [0, 0], sizes = [4, 64], strides = [1, 1]} : vector<4x96xf32> to vector<4x64xf32>
    %318 = arith.addf %316, %317 : vector<4x64xf32>
    %cst_71 = arith.constant 5.000000e-01 : f32
    %319 = vector.broadcast %cst_71 : f32 to vector<4x64xf32>
    %320 = arith.mulf %319, %318 : vector<4x64xf32>
    %321 = math.tanh %320 : vector<4x64xf32>
    %cst_72 = arith.constant 1.000000e+00 : f32
    %322 = vector.broadcast %cst_72 : f32 to vector<4x64xf32>
    %323 = arith.addf %321, %322 : vector<4x64xf32>
    %cst_73 = arith.constant 5.000000e-01 : f32
    %324 = vector.broadcast %cst_73 : f32 to vector<4x64xf32>
    %325 = arith.mulf %324, %323 : vector<4x64xf32>
    %326 = vector.extract_strided_slice %325 {offsets = [0, 0], sizes = [4, 32], strides = [1, 1]} : vector<4x64xf32> to vector<4x32xf32>
    %327 = vector.extract_strided_slice %325 {offsets = [0, 32], sizes = [4, 32], strides = [1, 1]} : vector<4x64xf32> to vector<4x32xf32>
    %328 = vector.extract_strided_slice %315 {offsets = [0, 64], sizes = [4, 32], strides = [1, 1]} : vector<4x96xf32> to vector<4x32xf32>
    %329 = vector.extract_strided_slice %290 {offsets = [0, 64], sizes = [4, 32], strides = [1, 1]} : vector<4x96xf32> to vector<4x32xf32>
    %330 = arith.addf %329, %18 : vector<4x32xf32>
    %331 = arith.mulf %326, %330 : vector<4x32xf32>
    %332 = arith.addf %328, %331 : vector<4x32xf32>
    %333 = math.tanh %332 : vector<4x32xf32>
    %cst_74 = arith.constant 1.000000e+00 : f32
    %334 = vector.broadcast %cst_74 : f32 to vector<4x32xf32>
    %335 = arith.subf %334, %327 : vector<4x32xf32>
    %336 = arith.mulf %335, %333 : vector<4x32xf32>
    %337 = arith.mulf %327, %285 : vector<4x32xf32>
    %338 = arith.addf %336, %337 : vector<4x32xf32>
    %339 = vector.extract_strided_slice %8 {offsets = [24, 0], sizes = [4, 96], strides = [1, 1]} : vector<32x96xf32> to vector<4x96xf32>
    %340 = tpu.concatenate %313, %338 in 1 : vector<4x32xf32>, vector<4x32xf32> -> vector<4x64xf32>
    %cst_75 = arith.constant dense<0.000000e+00> : vector<4x192xf32>
    %341 = tpu.matmul %340, %1, %cst_75 {dimension_numbers = #tpu.dot_dimension_numbers<[1], [0], [0], [1], [0, 0, 1, 1], [], []>} : vector<4x64xf32>, vector<64x192xf32>, vector<4x192xf32> -> vector<4x192xf32>
    %342 = vector.extract_strided_slice %341 {offsets = [0, 0], sizes = [4, 96], strides = [1, 1]} : vector<4x192xf32> to vector<4x96xf32>
    %343 = vector.extract_strided_slice %341 {offsets = [0, 96], sizes = [4, 96], strides = [1, 1]} : vector<4x192xf32> to vector<4x96xf32>
    %344 = vector.extract_strided_slice %339 {offsets = [0, 0], sizes = [4, 64], strides = [1, 1]} : vector<4x96xf32> to vector<4x64xf32>
    %345 = vector.extract_strided_slice %342 {offsets = [0, 0], sizes = [4, 64], strides = [1, 1]} : vector<4x96xf32> to vector<4x64xf32>
    %346 = arith.addf %344, %345 : vector<4x64xf32>
    %cst_76 = arith.constant 5.000000e-01 : f32
    %347 = vector.broadcast %cst_76 : f32 to vector<4x64xf32>
    %348 = arith.mulf %347, %346 : vector<4x64xf32>
    %349 = math.tanh %348 : vector<4x64xf32>
    %cst_77 = arith.constant 1.000000e+00 : f32
    %350 = vector.broadcast %cst_77 : f32 to vector<4x64xf32>
    %351 = arith.addf %349, %350 : vector<4x64xf32>
    %cst_78 = arith.constant 5.000000e-01 : f32
    %352 = vector.broadcast %cst_78 : f32 to vector<4x64xf32>
    %353 = arith.mulf %352, %351 : vector<4x64xf32>
    %354 = vector.extract_strided_slice %353 {offsets = [0, 0], sizes = [4, 32], strides = [1, 1]} : vector<4x64xf32> to vector<4x32xf32>
    %355 = vector.extract_strided_slice %353 {offsets = [0, 32], sizes = [4, 32], strides = [1, 1]} : vector<4x64xf32> to vector<4x32xf32>
    %356 = vector.extract_strided_slice %339 {offsets = [0, 64], sizes = [4, 32], strides = [1, 1]} : vector<4x96xf32> to vector<4x32xf32>
    %357 = vector.extract_strided_slice %342 {offsets = [0, 64], sizes = [4, 32], strides = [1, 1]} : vector<4x96xf32> to vector<4x32xf32>
    %358 = arith.addf %357, %15 : vector<4x32xf32>
    %359 = arith.mulf %354, %358 : vector<4x32xf32>
    %360 = arith.addf %356, %359 : vector<4x32xf32>
    %361 = math.tanh %360 : vector<4x32xf32>
    %cst_79 = arith.constant 1.000000e+00 : f32
    %362 = vector.broadcast %cst_79 : f32 to vector<4x32xf32>
    %363 = arith.subf %362, %355 : vector<4x32xf32>
    %364 = arith.mulf %363, %361 : vector<4x32xf32>
    %365 = arith.mulf %355, %313 : vector<4x32xf32>
    %366 = arith.addf %364, %365 : vector<4x32xf32>
    %cst_80 = arith.constant dense<0.000000e+00> : vector<4x96xf32>
    %367 = tpu.matmul %366, %0, %cst_80 {dimension_numbers = #tpu.dot_dimension_numbers<[1], [0], [0], [1], [0, 0, 1, 1], [], []>} : vector<4x32xf32>, vector<32x96xf32>, vector<4x96xf32> -> vector<4x96xf32>
    %368 = arith.addf %367, %11 : vector<4x96xf32>
    %369 = vector.extract_strided_slice %368 {offsets = [0, 0], sizes = [4, 64], strides = [1, 1]} : vector<4x96xf32> to vector<4x64xf32>
    %370 = vector.extract_strided_slice %343 {offsets = [0, 0], sizes = [4, 64], strides = [1, 1]} : vector<4x96xf32> to vector<4x64xf32>
    %371 = arith.addf %369, %370 : vector<4x64xf32>
    %cst_81 = arith.constant 5.000000e-01 : f32
    %372 = vector.broadcast %cst_81 : f32 to vector<4x64xf32>
    %373 = arith.mulf %372, %371 : vector<4x64xf32>
    %374 = math.tanh %373 : vector<4x64xf32>
    %cst_82 = arith.constant 1.000000e+00 : f32
    %375 = vector.broadcast %cst_82 : f32 to vector<4x64xf32>
    %376 = arith.addf %374, %375 : vector<4x64xf32>
    %cst_83 = arith.constant 5.000000e-01 : f32
    %377 = vector.broadcast %cst_83 : f32 to vector<4x64xf32>
    %378 = arith.mulf %377, %376 : vector<4x64xf32>
    %379 = vector.extract_strided_slice %378 {offsets = [0, 0], sizes = [4, 32], strides = [1, 1]} : vector<4x64xf32> to vector<4x32xf32>
    %380 = vector.extract_strided_slice %378 {offsets = [0, 32], sizes = [4, 32], strides = [1, 1]} : vector<4x64xf32> to vector<4x32xf32>
    %381 = vector.extract_strided_slice %368 {offsets = [0, 64], sizes = [4, 32], strides = [1, 1]} : vector<4x96xf32> to vector<4x32xf32>
    %382 = vector.extract_strided_slice %343 {offsets = [0, 64], sizes = [4, 32], strides = [1, 1]} : vector<4x96xf32> to vector<4x32xf32>
    %383 = arith.addf %382, %18 : vector<4x32xf32>
    %384 = arith.mulf %379, %383 : vector<4x32xf32>
    %385 = arith.addf %381, %384 : vector<4x32xf32>
    %386 = math.tanh %385 : vector<4x32xf32>
    %cst_84 = arith.constant 1.000000e+00 : f32
    %387 = vector.broadcast %cst_84 : f32 to vector<4x32xf32>
    %388 = arith.subf %387, %380 : vector<4x32xf32>
    %389 = arith.mulf %388, %386 : vector<4x32xf32>
    %390 = arith.mulf %380, %338 : vector<4x32xf32>
    %391 = arith.addf %389, %390 : vector<4x32xf32>
    %392 = vector.extract_strided_slice %8 {offsets = [28, 0], sizes = [4, 96], strides = [1, 1]} : vector<32x96xf32> to vector<4x96xf32>
    %393 = tpu.concatenate %366, %391 in 1 : vector<4x32xf32>, vector<4x32xf32> -> vector<4x64xf32>
    %cst_85 = arith.constant dense<0.000000e+00> : vector<4x192xf32>
    %394 = tpu.matmul %393, %1, %cst_85 {dimension_numbers = #tpu.dot_dimension_numbers<[1], [0], [0], [1], [0, 0, 1, 1], [], []>} : vector<4x64xf32>, vector<64x192xf32>, vector<4x192xf32> -> vector<4x192xf32>
    %395 = vector.extract_strided_slice %394 {offsets = [0, 0], sizes = [4, 96], strides = [1, 1]} : vector<4x192xf32> to vector<4x96xf32>
    %396 = vector.extract_strided_slice %394 {offsets = [0, 96], sizes = [4, 96], strides = [1, 1]} : vector<4x192xf32> to vector<4x96xf32>
    %397 = vector.extract_strided_slice %392 {offsets = [0, 0], sizes = [4, 64], strides = [1, 1]} : vector<4x96xf32> to vector<4x64xf32>
    %398 = vector.extract_strided_slice %395 {offsets = [0, 0], sizes = [4, 64], strides = [1, 1]} : vector<4x96xf32> to vector<4x64xf32>
    %399 = arith.addf %397, %398 : vector<4x64xf32>
    %cst_86 = arith.constant 5.000000e-01 : f32
    %400 = vector.broadcast %cst_86 : f32 to vector<4x64xf32>
    %401 = arith.mulf %400, %399 : vector<4x64xf32>
    %402 = math.tanh %401 : vector<4x64xf32>
    %cst_87 = arith.constant 1.000000e+00 : f32
    %403 = vector.broadcast %cst_87 : f32 to vector<4x64xf32>
    %404 = arith.addf %402, %403 : vector<4x64xf32>
    %cst_88 = arith.constant 5.000000e-01 : f32
    %405 = vector.broadcast %cst_88 : f32 to vector<4x64xf32>
    %406 = arith.mulf %405, %404 : vector<4x64xf32>
    %407 = vector.extract_strided_slice %406 {offsets = [0, 0], sizes = [4, 32], strides = [1, 1]} : vector<4x64xf32> to vector<4x32xf32>
    %408 = vector.extract_strided_slice %406 {offsets = [0, 32], sizes = [4, 32], strides = [1, 1]} : vector<4x64xf32> to vector<4x32xf32>
    %409 = vector.extract_strided_slice %392 {offsets = [0, 64], sizes = [4, 32], strides = [1, 1]} : vector<4x96xf32> to vector<4x32xf32>
    %410 = vector.extract_strided_slice %395 {offsets = [0, 64], sizes = [4, 32], strides = [1, 1]} : vector<4x96xf32> to vector<4x32xf32>
    %411 = arith.addf %410, %15 : vector<4x32xf32>
    %412 = arith.mulf %407, %411 : vector<4x32xf32>
    %413 = arith.addf %409, %412 : vector<4x32xf32>
    %414 = math.tanh %413 : vector<4x32xf32>
    %cst_89 = arith.constant 1.000000e+00 : f32
    %415 = vector.broadcast %cst_89 : f32 to vector<4x32xf32>
    %416 = arith.subf %415, %408 : vector<4x32xf32>
    %417 = arith.mulf %416, %414 : vector<4x32xf32>
    %418 = arith.mulf %408, %366 : vector<4x32xf32>
    %419 = arith.addf %417, %418 : vector<4x32xf32>
    %cst_90 = arith.constant dense<0.000000e+00> : vector<4x96xf32>
    %420 = tpu.matmul %419, %0, %cst_90 {dimension_numbers = #tpu.dot_dimension_numbers<[1], [0], [0], [1], [0, 0, 1, 1], [], []>} : vector<4x32xf32>, vector<32x96xf32>, vector<4x96xf32> -> vector<4x96xf32>
    %421 = arith.addf %420, %11 : vector<4x96xf32>
    %422 = vector.extract_strided_slice %421 {offsets = [0, 0], sizes = [4, 64], strides = [1, 1]} : vector<4x96xf32> to vector<4x64xf32>
    %423 = vector.extract_strided_slice %396 {offsets = [0, 0], sizes = [4, 64], strides = [1, 1]} : vector<4x96xf32> to vector<4x64xf32>
    %424 = arith.addf %422, %423 : vector<4x64xf32>
    %cst_91 = arith.constant 5.000000e-01 : f32
    %425 = vector.broadcast %cst_91 : f32 to vector<4x64xf32>
    %426 = arith.mulf %425, %424 : vector<4x64xf32>
    %427 = math.tanh %426 : vector<4x64xf32>
    %cst_92 = arith.constant 1.000000e+00 : f32
    %428 = vector.broadcast %cst_92 : f32 to vector<4x64xf32>
    %429 = arith.addf %427, %428 : vector<4x64xf32>
    %cst_93 = arith.constant 5.000000e-01 : f32
    %430 = vector.broadcast %cst_93 : f32 to vector<4x64xf32>
    %431 = arith.mulf %430, %429 : vector<4x64xf32>
    %432 = vector.extract_strided_slice %431 {offsets = [0, 0], sizes = [4, 32], strides = [1, 1]} : vector<4x64xf32> to vector<4x32xf32>
    %433 = vector.extract_strided_slice %431 {offsets = [0, 32], sizes = [4, 32], strides = [1, 1]} : vector<4x64xf32> to vector<4x32xf32>
    %434 = vector.extract_strided_slice %421 {offsets = [0, 64], sizes = [4, 32], strides = [1, 1]} : vector<4x96xf32> to vector<4x32xf32>
    %435 = vector.extract_strided_slice %396 {offsets = [0, 64], sizes = [4, 32], strides = [1, 1]} : vector<4x96xf32> to vector<4x32xf32>
    %436 = arith.addf %435, %18 : vector<4x32xf32>
    %437 = arith.mulf %432, %436 : vector<4x32xf32>
    %438 = arith.addf %434, %437 : vector<4x32xf32>
    %439 = math.tanh %438 : vector<4x32xf32>
    %cst_94 = arith.constant 1.000000e+00 : f32
    %440 = vector.broadcast %cst_94 : f32 to vector<4x32xf32>
    %441 = arith.subf %440, %433 : vector<4x32xf32>
    %442 = arith.mulf %441, %439 : vector<4x32xf32>
    %443 = arith.mulf %433, %391 : vector<4x32xf32>
    %444 = arith.addf %442, %443 : vector<4x32xf32>
    %c0_95 = arith.constant 0 : index
    %c0_96 = arith.constant 0 : index
    %445 = vector.load %arg8[%c0_95, %c0_96] : memref<4x32xf32, #tpu.memory_space<vmem>>, vector<4x32xf32>
    tpu.vector_store %arg8[%c0_95, %c0_96], %444 {strides = array<i32>} : memref<4x32xf32, #tpu.memory_space<vmem>>, vector<4x32xf32>,
    return
  }
  func.func @transform_0(%arg0: i32) -> (i32, i32) {
    %c0_i32 = arith.constant 0 : i32
    %c0_i32_0 = arith.constant 0 : i32
    %c0_i32_1 = arith.constant 0 : i32
    return %c0_i32, %c0_i32_0 : i32, i32
  }
  func.func @transform_1(%arg0: i32) -> (i32, i32) {
    %c0_i32 = arith.constant 0 : i32
    %c0_i32_0 = arith.constant 0 : i32
    %c0_i32_1 = arith.constant 0 : i32
    return %c0_i32, %c0_i32_0 : i32, i32
  }
  func.func @transform_2(%arg0: i32) -> (i32, i32) {
    %c0_i32 = arith.constant 0 : i32
    %c0_i32_0 = arith.constant 0 : i32
    %c0_i32_1 = arith.constant 0 : i32
    return %c0_i32, %c0_i32_0 : i32, i32
  }
  func.func @transform_3(%arg0: i32) -> (i32, i32) {
    %c0_i32 = arith.constant 0 : i32
    %c0_i32_0 = arith.constant 0 : i32
    %c0_i32_1 = arith.constant 0 : i32
    return %c0_i32, %c0_i32_0 : i32, i32
  }
  func.func @transform_4(%arg0: i32) -> (i32, i32) {
    %c0_i32 = arith.constant 0 : i32
    %c0_i32_0 = arith.constant 0 : i32
    %c0_i32_1 = arith.constant 0 : i32
    return %c0_i32, %c0_i32_0 : i32, i32
  }
  func.func @transform_5(%arg0: i32) -> (i32, i32) {
    %c0_i32 = arith.constant 0 : i32
    %c0_i32_0 = arith.constant 0 : i32
    %c0_i32_1 = arith.constant 0 : i32
    return %c0_i32, %c0_i32_0 : i32, i32
  }
  func.func @transform_6(%arg0: i32) -> (i32, i32) {
    %c0_i32 = arith.constant 0 : i32
    %c0_i32_0 = arith.constant 0 : i32
    %c0_i32_1 = arith.constant 0 : i32
    return %c0_i32, %c0_i32_0 : i32, i32
  }
  func.func @transform_7(%arg0: i32) -> (i32, i32) {
    %c0_i32 = arith.constant 0 : i32
    %c0_i32_0 = arith.constant 0 : i32
    %c0_i32_1 = arith.constant 0 : i32
    return %c0_i32, %c0_i32_0 : i32, i32
  }
}

</mosaic_0001>

<bundles_post_ra>
// kernel: _gru_forward_impl.1
= control target key start
LH: loop header
LB: loop body
LE: loop exit
PB: predicated region body
PF: predicated region fallthrough
CT: control target
= control target key end

     0   :  { %v2366_v7 = vmov 0.0   ;;  %vm62_vm0 = vcmask 261120   ;;  %s2911_s0 = inlined_call_operand.vmem [shape: f32[32,32], index: 0, kind: input, shape index: {}]   ;;  %s2912_s1 = inlined_call_operand.vmem [shape: f32[32,96], index: 1, kind: input, shape index: {}]   ;;  %s2913_s2 = inlined_call_operand.vmem [shape: f32[1,96], index: 2, kind: input, shape index: {}]   ;;  %s2914_s3 = inlined_call_operand.vmem [shape: f32[64,192], index: 3, kind: input, shape index: {}]   ;;  %s2915_s4 = inlined_call_operand.vmem [shape: f32[32,96], index: 4, kind: input, shape index: {}]   ;;  %s2916_s5 = inlined_call_operand.vmem [shape: f32[1,96], index: 5, kind: input, shape index: {}]   ;;  %s2917_s6 = inlined_call_operand.vmem [shape: f32[1,64], index: 6, kind: input, shape index: {}]   ;;  %s2918_s7 = inlined_call_operand.hbm [shape: f32[4,32], index: 7, kind: output, shape index: {}]  }
   0x1   :  { %v32_v0 = vld [vmem:[%s2914_s3 + $0x8] sm:$0xff]  ;;  %v34_v1 = vld [vmem:[%s2914_s3 + $0x18] sm:$0xff]  ;;  %v31_v2 = vld [vmem:[%s2914_s3] sm:$0xff]  ;;  %242 = vmatprep.mubr.f32.mxu1 %v2366_v7 }
   0x2   :  { %v2422_v3 = vpack.c.bf16 %v34_v1, %v32_v0  ;;  %v33_v4 = vld [vmem:[%s2914_s3 + $0x10] sm:$0xff]  ;;  %v36_v5 = vld [vmem:[%s2914_s3 + $0x28] sm:$0xff]  ;;  %v38_v6 = vld [vmem:[%s2914_s3 + $0x38] sm:$0xff] }
   0x3   :  { %v2434_v8 = vpack.c.bf16 %v33_v4, %v31_v2  ;;  %v2436_v9 = vpack.c.bf16 %v38_v6, %v36_v5  ;;  %v51_v10 = vld [vmem:[%s2912_s1] sm:$0xff]  ;;  %v52_v11 = vld [vmem:[%s2912_s1 + $0x8] sm:$0xff]  ;;  %v37_v14 = vld [vmem:[%s2914_s3 + $0x30] sm:$0xff] }
   0x4   :  { %v35_v12 = vld [vmem:[%s2914_s3 + $0x20] sm:$0xff]  ;;  %2094 = vmatprep.subr.bf16.mxu1 %v2422_v3  ;;  %v2085_v13 = vpack.c.bf16 %v52_v11, %v51_v10  ;;  %v40_v15 = vld [vmem:[%s2914_s3 + $0x48] sm:$0xff]  ;;  %v42_v16 = vld [vmem:[%s2914_s3 + $0x58] sm:$0xff] }
   0x5   :  { %2096 = vmatpush1.bf16.msra.mxu1 %v2434_v8  ;;  %v2458_v17 = vpack.c.bf16 %v37_v14, %v35_v12  ;;  %v53_v18 = vld [vmem:[%s2912_s1 + $0x10] sm:$0xff]  ;;  %v54_v19 = vld [vmem:[%s2912_s1 + $0x18] sm:$0xff]  ;;  %v2467_v20 = vpack.c.bf16 %v42_v16, %v40_v15  ;;  %v39_v22 = vld [vmem:[%s2914_s3 + $0x40] sm:$0xff] }
   0x6   :  { %2098 = vmatprep.subr.bf16.mxu1 %v2436_v9  ;;  %2086 = vmatprep.subr.bf16.mxu0 %v2085_v13  ;;  %v2089_v21 = vpack.c.bf16 %v54_v19, %v53_v18  ;;  %v41_v23 = vld [vmem:[%s2914_s3 + $0x50] sm:$0xff]  ;;  %v47_v24 = vld [vmem:[%s2911_s0] sm:$0xff]  ;;  %v44_v25 = vld [vmem:[%s2914_s3 + $0x68] sm:$0xff] }
   0x7   :  { %2088 = vmatpush3.bf16.msra.mxu0 %v2085_v13  ;;  %1991 = vmatprep.mubr.msk.f32.mxu0 %vm62_vm0, %v47_v24  ;;  %v46_v26 = vld [vmem:[%s2914_s3 + $0x78] sm:$0xff]  ;;  %v2488_v27 = vld [vmem:[%s2917_s6] ss:$0 sm:$0xff] }
   0x8   :  { %2090 = vmatprep.subr.bf16.mxu0 %v2089_v21 }
   0x9   :  { %12 = vsyncpa [#allocation3], 0  ;;  %2100 = vmatpush1.bf16.msra.mxu1 %v2458_v17  ;;  %v2491_v28 = vpack.c.bf16 %v41_v23, %v39_v22  ;;  %s2367_s17 = smov 64   ;;  %v2496_v29 = vpack.c.bf16 %v46_v26, %v44_v25  ;;  %v43_v30 = vld [vmem:[%s2914_s3 + $0x60] sm:$0xff]  ;;  %v45_v31 = vld [vmem:[%s2914_s3 + $0x70] sm:$0xff]  ;;  %v2368_v54 = vmov 0.0|0.0  }
   0xa   :  { %254 = vrot.lane.b32.xlu0 %v2488_v27, %s2367_s17  ;;  %2102 = vmatprep.subr.bf16.mxu1 %v2467_v20  ;;  %v48_v32 = vld [vmem:[%s2911_s0 + $0x8] sm:$0xff]  ;;  %v2508_v33 = vpack.c.bf16 %v45_v31, %v43_v30  ;;  %v2523_v40 = vld [vmem:[%s2913_s2] ss:$0 sm:$0xff]  ;;  %v49_v53 = vld [vmem:[%s2911_s0 + $0x10] sm:$0xff]  ;;  %vm2369_vm1 = vmmov 0   ;;  %vm174_vm2 = vcmask 523264  }
   0xb   :  { %2092 = vmatpush3.bf16.msra.mxu0 %v2089_v21  ;;  %v27_v51 = vld [vmem:[%s2915_s4] sm:$0xff]  ;;  %v28_v52 = vld [vmem:[%s2915_s4 + $0x8] sm:$0xff]  ;;  %v50_v56 = vld [vmem:[%s2911_s0 + $0x18] sm:$0xff]  ;;  %s2370_s0 = smov 96   ;;  %vm1897_vm3 = vcmask 257024  }
   0xc   :  { %2109 = vmatprep.subr.bf16.mxu0 %v2368_v54  ;;  %v2541_v55 = vpack.c.bf16 %v28_v52, %v27_v51  ;;  %v29_v57 = vld [vmem:[%s2915_s4 + $0x10] sm:$0xff]  ;;  %v30_v58 = vld [vmem:[%s2915_s4 + $0x18] sm:$0xff]  ;;  %s2371_s4 = smov 32   ;;  %v2595_v10 = vld [vmem:[%s2916_s5] ss:$0 sm:$0xff] }
   0xd   :  { %2104 = vmatpush1.bf16.msra.mxu1 %v2491_v28  ;;  %v2556_v59 = vpack.c.bf16 %v30_v58, %v29_v57 }
   0xe   :  { %2106 = vmatprep.subr.bf16.mxu1 %v2496_v29  ;;  %1992 = vmatmul.mubr.msk.f32.vlgmr.msra.gmra.mrb[0].mxu0 %vm62_vm0, %v48_v32 }
   0xf   :  { %1994 = vmatprep.mubr.msk.f32.mxu0 %vm62_vm0, %v49_v53  ;;  %2111 = vmatpush3.bf16.msra.mxu0 %v2541_v55 }
  0x10   :  { %2112 = vmatprep.subr.bf16.mxu0 %v2368_v54 }
  0x11   :  { %2108 = vmatpush1.bf16.msra.mxu1 %v2508_v33 }
  0x12   :  { %1995 = vmatmul.mubr.msk.f32.gmra.mrb[2].mxu0 %vm62_vm0, %v50_v56  ;;  %2131 = vmatprep.subr.bf16.mxu1 %v2368_v54 }
  0x13   :  { %2005 = vmatprep.mubr.msk.f32.mxu0 %vm2369_vm1, %v2366_v7  ;;  %2114 = vmatpush3.bf16.msra.mxu0 %v2556_v59 }
  0x14   :  { %243 = vmatmul.mubr.f32.vlgmr.msra.gmra.mrb[0].mxu1 %v2366_v7  ;;  %2116 = vmatprep.subr.bf16.mxu0 %v2422_v3 }
  0x15   :  { %2133 = vmatpush3.bf16.msra.mxu1 %v2541_v55  ;;  %2016 = vmatprep.mubr.msk.f32.mxu1 %vm2369_vm1, %v2366_v7 }
  0x16   :  { %2134 = vmatprep.subr.bf16.mxu1 %v2368_v54 }
  0x19   :  { %2136 = vmatpush3.bf16.msra.mxu1 %v2556_v59 }
  0x1a   :  { %2138 = vmatprep.subr.bf16.mxu1 %v2422_v3 }
  0x7c   :  { %v2516_v36 = vpop.permute.xlu0 %254 }
  0xe1   :  { %v2514_v34 = vpop.f32.mrb[0].mxu0 }
  0xe2   :  { %v141_v35 = vpop.f32.mrb[1].mxu0 }
  0xe3   :  { %v2526_v41 = vadd.f32 %v2523_v40, %v141_v35 }
  0xe5   :  { %v2578_v4 = vpop.f32.mrb[2].mxu0 }
  0xe6   :  { %v2580_v5 = vpop.f32.mrb[3].mxu0 }
  0xe7   :  { %v244_v37 = vpop.f32.mrb[0].mxu1 }
  0xe8   :  { %v257_v38 = vadd.f32 %v2516_v36, %v244_v37  ;;  %v246_v39 = vpop.f32.mrb[1].mxu1  ;;  %v249_v42 = vadd.f32 %v244_v37, %v2526_v41 }
  0xe9   :  { %v365_v61 = vadd.f32 %v2488_v27, %v246_v39 }
  0xea   :  { %259 = vrot.lane.b32.xlu0 %v257_v38, %s2367_s17  ;;  %v250_v43 = vmul.f32 0.5, %v249_v42 }
  0xec   :  { %2276 = vtanh.f32 %v250_v43 }
  0xf6   :  { %v2277_v44 = vpop.eup %2276 }
  0xf7   :  { %v252_v45 = vadd.f32 1.0, %v2277_v44 }
  0xf9   :  { %v253_v46 = vmul.f32 0.5, %v252_v45 }
  0xfb   :  { %v269_v62 = vsub.f32 1.0, %v253_v46  ;;  %v275_v0 = vmul.f32 0.0, %v253_v46 }
 0x15c   :  { %v260_v47 = vpop.permute.xlu0 %259 }
 0x15d   :  { %v262_v48 = vmul.f32 %v260_v47, %v253_v46 }
 0x15f   :  { %264 = vrot.lane.b32.xlu1 %v262_v48, %s2367_s17 }
 0x1d1   :  { %v265_v49 = vpop.permute.xlu1 %264 }
 0x1d2   :  { %v267_v50 = vadd.f32 %v265_v49, %v2526_v41 }
 0x1d4   :  { %2278 = vtanh.f32 %v267_v50 }
 0x1de   :  { %v2279_v60 = vpop.eup %2278 }
 0x1df   :  { %271 = vrot.lane.b32.xlu1 %v2279_v60, %s2370_s0 }
 0x1e3   :  { %354 = vrot.lane.b32.xlu1 %v244_v37, %s2371_s4 }
 0x1e7   :  { %367 = vrot.lane.b32.xlu1 %v365_v61, %s2370_s0 }
 0x251   :  { %v272_v63 = vpop.permute.xlu1 %271 }
 0x252   :  { %v274_v1 = vmul.f32 %v272_v63, %v269_v62 }
 0x254   :  { %v2573_v2 = vadd.f32 %v275_v0, %v274_v1 }
 0x255   :  { %v355_v13 = vpop.permute.xlu1 %354 }
 0x256   :  { %278 = vrot.lane.b32.xlu0 %v2573_v2, %s2370_s0  ;;  %v488_v62 = vrot.slane %v2573_v2, 4 }
 0x259   :  { %v368_v24 = vpop.permute.xlu1 %367 }
 0x25a   :  { %356 = vrot.lane.b32.xlu0 %v246_v39, %s2371_s4 }
 0x2c8   :  { %v279_v6 = vpop.permute.xlu0 %278 }
 0x2c9   :  { %2006 = vmatmul.mubr.msk.f32.vlgmr.msra.gmra.mrb[4].mxu0 %vm62_vm0, %v279_v6 }
 0x2ca   :  { %2118 = vmatpush1.bf16.msra.mxu0 %v2434_v8  ;;  %454 = vmatprep.mubr.f32.mxu0 %v2366_v7 }
 0x2cb   :  { %2120 = vmatprep.subr.bf16.mxu0 %v2436_v9 }
 0x2cc   :  { %v357_v11 = vpop.permute.xlu0 %356 }
 0x2cd   :  { %v358_v16 = vsel %vm62_vm0, %v355_v13, %v357_v11 }
 0x2ce   :  { %2122 = vmatpush1.bf16.msra.mxu0 %v2458_v17 }
 0x2cf   :  { %2124 = vmatprep.subr.bf16.mxu0 %v2467_v20 }
 0x2d2   :  { %2126 = vmatpush1.bf16.msra.mxu0 %v2491_v28 }
 0x2d3   :  { %2128 = vmatprep.subr.bf16.mxu0 %v2496_v29 }
 0x2d6   :  { %2130 = vmatpush1.bf16.msra.mxu0 %v2508_v33 }
 0x2d7   :  { %2153 = vmatprep.subr.bf16.mxu0 %v2368_v54 }
 0x39c   :  { %v348_v12 = vpop.f32.mrb[4].mxu0 }
 0x39d   :  { %v349_v14 = vadd.f32 %v2595_v10, %v348_v12  ;;  %v2007_v15 = vpop.f32.mrb[5].mxu0 }
 0x39f   :  { %v360_v18 = vadd.f32 %v358_v16, %v349_v14 }
 0x3a1   :  { %v361_v19 = vmul.f32 0.5, %v360_v18 }
 0x3a3   :  { %2280 = vtanh.f32 %v361_v19 }
 0x3ad   :  { %v2281_v21 = vpop.eup %2280 }
 0x3ae   :  { %v363_v22 = vadd.f32 1.0, %v2281_v21 }
 0x3b0   :  { %v364_v23 = vmul.f32 0.5, %v363_v22 }
 0x3b2   :  { %v370_v25 = vmul.f32 %v368_v24, %v364_v23  ;;  %v377_v32 = vsub.f32 1.0, %v364_v23  ;;  %v383_v37 = vmul.f32 0.0, %v364_v23 }
 0x3b4   :  { %372 = vrot.lane.b32.xlu0 %v370_v25, %s2367_s17 }
 0x426   :  { %v373_v26 = vpop.permute.xlu0 %372 }
 0x427   :  { %v375_v30 = vadd.f32 %v373_v26, %v349_v14 }
 0x429   :  { %2282 = vtanh.f32 %v375_v30 }
 0x433   :  { %v2283_v31 = vpop.eup %2282 }
 0x434   :  { %379 = vrot.lane.b32.xlu1 %v2283_v31, %s2370_s0 }
 0x4a6   :  { %v380_v35 = vpop.permute.xlu1 %379 }
 0x4a7   :  { %v382_v38 = vmul.f32 %v380_v35, %v377_v32 }
 0x4a9   :  { %v2601_v39 = vadd.f32 %v383_v37, %v382_v38 }
 0x4ab   :  { %v386_v42 = vsel %vm62_vm0, %v279_v6, %v2601_v39 }
 0x4ac   :  { %1921 = vmatmul.mubr.msk.f32.vlgmr.msra.gmra.mrb[6].mxu0 %vm174_vm2, %v386_v42 }
 0x4ad   :  { %2155 = vmatpush3.bf16.msra.mxu0 %v2541_v55  ;;  %2027 = vmatprep.mubr.msk.f32.mxu0 %vm2369_vm1, %v2366_v7 }
 0x4ae   :  { %2156 = vmatprep.subr.bf16.mxu0 %v2368_v54 }
 0x4b1   :  { %2158 = vmatpush3.bf16.msra.mxu0 %v2556_v59 }
 0x4b2   :  { %2160 = vmatprep.subr.bf16.mxu0 %v2422_v3 }
 0x57f   :  { %v456_v43 = vpop.f32.mrb[6].mxu0 }
 0x580   :  { %v469_v44 = vadd.f32 %v456_v43, %v2516_v36  ;;  %v458_v45 = vpop.f32.mrb[7].mxu0  ;;  %v462_v47 = vrot.slane %v456_v43, 4 }
 0x581   :  { %v580_v61 = vadd.f32 %v2488_v27, %v458_v45 }
 0x582   :  { %v471_v46 = vrot.slane %v469_v44, 4  ;;  %v464_v48 = vadd.f32 %v462_v47, %v2526_v41 }
 0x584   :  { %472 = vrot.lane.b32.xlu0 %v471_v46, %s2367_s17  ;;  %v465_v49 = vmul.f32 0.5, %v464_v48 }
 0x586   :  { %2284 = vtanh.f32 %v465_v49 }
 0x590   :  { %v2285_v50 = vpop.eup %2284 }
 0x591   :  { %v467_v51 = vadd.f32 1.0, %v2285_v50  ;;  %v2661_v50 = vadd.f32 %v2514_v34, %v2523_v40 }
 0x593   :  { %v468_v52 = vmul.f32 0.5, %v467_v51 }
 0x595   :  { %v482_v63 = vsub.f32 1.0, %v468_v52  ;;  %v490_v1 = vmul.f32 %v488_v62, %v468_v52 }
 0x5f6   :  { %v473_v53 = vpop.permute.xlu0 %472 }
 0x5f7   :  { %v475_v56 = vmul.f32 %v473_v53, %v468_v52 }
 0x5f9   :  { %477 = vrot.lane.b32.xlu1 %v475_v56, %s2367_s17 }
 0x66b   :  { %v478_v57 = vpop.permute.xlu1 %477 }
 0x66c   :  { %v480_v58 = vadd.f32 %v478_v57, %v2526_v41 }
 0x66e   :  { %2286 = vtanh.f32 %v480_v58 }
 0x678   :  { %v2287_v60 = vpop.eup %2286 }
 0x679   :  { %484 = vrot.lane.b32.xlu0 %v2287_v60, %s2370_s0 }
 0x67d   :  { %569 = vrot.lane.b32.xlu0 %v456_v43, %s2371_s4 }
 0x681   :  { %582 = vrot.lane.b32.xlu0 %v580_v61, %s2370_s0 }
 0x6eb   :  { %v485_v0 = vpop.permute.xlu0 %484 }
 0x6ec   :  { %v487_v6 = vmul.f32 %v485_v0, %v482_v63 }
 0x6ee   :  { %v2622_v11 = vadd.f32 %v490_v1, %v487_v6 }
 0x6ef   :  { %v570_v14 = vpop.permute.xlu0 %569 }
 0x6f0   :  { %v493_v41 = vrot.slane %v2622_v11, 4 }
 0x6f2   :  { %494 = vrot.lane.b32.xlu1 %v493_v41, %s2370_s0 }
 0x6f3   :  { %v583_v25 = vpop.permute.xlu0 %582 }
 0x6f6   :  { %571 = vrot.lane.b32.xlu1 %v458_v45, %s2371_s4 }
 0x764   :  { %v495_v12 = vpop.permute.xlu1 %494 }
 0x765   :  { %2017 = vmatmul.mubr.msk.f32.vlgmr.msra.gmra.mrb[2].mxu1 %vm62_vm0, %v495_v12 }
 0x766   :  { %2140 = vmatpush1.bf16.msra.mxu1 %v2434_v8  ;;  %675 = vmatprep.mubr.f32.mxu1 %v2366_v7 }
 0x767   :  { %2142 = vmatprep.subr.bf16.mxu1 %v2436_v9 }
 0x768   :  { %v572_v2 = vpop.permute.xlu1 %571 }
 0x769   :  { %v573_v18 = vsel %vm62_vm0, %v570_v14, %v572_v2 }
 0x76a   :  { %2144 = vmatpush1.bf16.msra.mxu1 %v2458_v17 }
 0x76b   :  { %2146 = vmatprep.subr.bf16.mxu1 %v2467_v20 }
 0x76e   :  { %2148 = vmatpush1.bf16.msra.mxu1 %v2491_v28 }
 0x76f   :  { %2150 = vmatprep.subr.bf16.mxu1 %v2496_v29 }
 0x772   :  { %2152 = vmatpush1.bf16.msra.mxu1 %v2508_v33 }
 0x773   :  { %2175 = vmatprep.subr.bf16.mxu1 %v2368_v54 }
 0x838   :  { %v564_v13 = vpop.f32.mrb[2].mxu1 }
 0x839   :  { %v565_v15 = vadd.f32 %v2595_v10, %v564_v13  ;;  %v2018_v16 = vpop.f32.mrb[3].mxu1 }
 0x83b   :  { %v575_v19 = vadd.f32 %v573_v18, %v565_v15 }
 0x83d   :  { %v576_v21 = vmul.f32 0.5, %v575_v19 }
 0x83f   :  { %2288 = vtanh.f32 %v576_v21 }
 0x849   :  { %v2289_v22 = vpop.eup %2288 }
 0x84a   :  { %v578_v23 = vadd.f32 1.0, %v2289_v22 }
 0x84c   :  { %v579_v24 = vmul.f32 0.5, %v578_v23 }
 0x84e   :  { %v585_v26 = vmul.f32 %v583_v25, %v579_v24  ;;  %v592_v35 = vsub.f32 1.0, %v579_v24  ;;  %v598_v38 = vmul.f32 %v579_v24, %v2601_v39 }
 0x850   :  { %587 = vrot.lane.b32.xlu1 %v585_v26, %s2367_s17 }
 0x854   :  { %600 = vrot.lane.b32.xlu1 %v2622_v11, %s2370_s0 }
 0x8c2   :  { %v588_v30 = vpop.permute.xlu1 %587 }
 0x8c3   :  { %v590_v31 = vadd.f32 %v588_v30, %v565_v15 }
 0x8c5   :  { %2290 = vtanh.f32 %v590_v31 }
 0x8c6   :  { %v601_v45 = vpop.permute.xlu1 %600 }
 0x8cf   :  { %v2291_v32 = vpop.eup %2290 }
 0x8d0   :  { %594 = vrot.lane.b32.xlu0 %v2291_v32, %s2370_s0 }
 0x942   :  { %v595_v37 = vpop.permute.xlu0 %594 }
 0x943   :  { %v597_v42 = vmul.f32 %v595_v37, %v592_v35 }
 0x945   :  { %v2646_v43 = vadd.f32 %v598_v38, %v597_v42 }
 0x947   :  { %v604_v44 = vrot.slane %v2646_v43, 4 }
 0x949   :  { %v606_v46 = vsel %vm62_vm0, %v601_v45, %v604_v44 }
 0x94a   :  { %v608_v47 = vrot.slane %v606_v46, 4 }
 0x94c   :  { %1923 = vmatmul.mubr.msk.f32.vlgmr.msra.gmra.mrb[4].mxu1 %vm174_vm2, %v608_v47 }
 0x94d   :  { %2177 = vmatpush3.bf16.msra.mxu1 %v2541_v55  ;;  %2038 = vmatprep.mubr.msk.f32.mxu1 %vm2369_vm1, %v2366_v7 }
 0x94e   :  { %2178 = vmatprep.subr.bf16.mxu1 %v2368_v54 }
 0x951   :  { %2180 = vmatpush3.bf16.msra.mxu1 %v2556_v59 }
 0x952   :  { %2182 = vmatprep.subr.bf16.mxu1 %v2422_v3 }
 0xa1f   :  { %v677_v39 = vpop.f32.mrb[4].mxu1 }
 0xa20   :  { %v687_v48 = vadd.f32 %v677_v39, %v2516_v36  ;;  %v679_v49 = vpop.f32.mrb[5].mxu1  ;;  %v682_v51 = vadd.f32 %v677_v39, %v2661_v50 }
 0xa21   :  { %v796_v34 = vadd.f32 %v2488_v27, %v679_v49 }
 0xa22   :  { %689 = vrot.lane.b32.xlu0 %v687_v48, %s2367_s17  ;;  %v683_v52 = vmul.f32 0.5, %v682_v51 }
 0xa24   :  { %2292 = vtanh.f32 %v683_v52 }
 0xa2e   :  { %v2293_v53 = vpop.eup %2292 }
 0xa2f   :  { %v685_v56 = vadd.f32 1.0, %v2293_v53 }
 0xa31   :  { %v686_v57 = vmul.f32 0.5, %v685_v56 }
 0xa33   :  { %v699_v0 = vsub.f32 1.0, %v686_v57  ;;  %v706_v6 = vmul.f32 %v686_v57, %v493_v41 }
 0xa94   :  { %v690_v58 = vpop.permute.xlu0 %689 }
 0xa95   :  { %v692_v60 = vmul.f32 %v690_v58, %v686_v57 }
 0xa97   :  { %694 = vrot.lane.b32.xlu1 %v692_v60, %s2367_s17 }
 0xb09   :  { %v695_v61 = vpop.permute.xlu1 %694 }
 0xb0a   :  { %v697_v62 = vadd.f32 %v695_v61, %v2661_v50 }
 0xb0c   :  { %2294 = vtanh.f32 %v697_v62 }
 0xb16   :  { %v2295_v63 = vpop.eup %2294 }
 0xb17   :  { %701 = vrot.lane.b32.xlu0 %v2295_v63, %s2370_s0 }
 0xb1b   :  { %785 = vrot.lane.b32.xlu0 %v677_v39, %s2371_s4 }
 0xb1f   :  { %798 = vrot.lane.b32.xlu0 %v796_v34, %s2370_s0 }
 0xb89   :  { %v702_v1 = vpop.permute.xlu0 %701 }
 0xb8a   :  { %v704_v12 = vmul.f32 %v702_v1, %v699_v0 }
 0xb8c   :  { %v2672_v2 = vadd.f32 %v706_v6, %v704_v12 }
 0xb8d   :  { %v786_v14 = vpop.permute.xlu0 %785 }
 0xb8e   :  { %709 = vrot.lane.b32.xlu1 %v2672_v2, %s2370_s0  ;;  %v919_v34 = vrot.slane %v2672_v2, 4 }
 0xb91   :  { %v799_v25 = vpop.permute.xlu0 %798 }
 0xb92   :  { %787 = vrot.lane.b32.xlu1 %v679_v49, %s2371_s4 }
 0xc00   :  { %v710_v13 = vpop.permute.xlu1 %709 }
 0xc01   :  { %2028 = vmatmul.mubr.msk.f32.vlgmr.msra.gmra.mrb[8].mxu0 %vm62_vm0, %v710_v13 }
 0xc02   :  { %2162 = vmatpush1.bf16.msra.mxu0 %v2434_v8  ;;  %885 = vmatprep.mubr.f32.mxu0 %v2366_v7 }
 0xc03   :  { %2164 = vmatprep.subr.bf16.mxu0 %v2436_v9 }
 0xc04   :  { %v788_v11 = vpop.permute.xlu1 %787 }
 0xc05   :  { %v789_v18 = vsel %vm62_vm0, %v786_v14, %v788_v11 }
 0xc06   :  { %2166 = vmatpush1.bf16.msra.mxu0 %v2458_v17 }
 0xc07   :  { %2168 = vmatprep.subr.bf16.mxu0 %v2467_v20 }
 0xc0a   :  { %2170 = vmatpush1.bf16.msra.mxu0 %v2491_v28 }
 0xc0b   :  { %2172 = vmatprep.subr.bf16.mxu0 %v2496_v29 }
 0xc0e   :  { %2174 = vmatpush1.bf16.msra.mxu0 %v2508_v33 }
 0xc0f   :  { %2197 = vmatprep.subr.bf16.mxu0 %v2368_v54 }
 0xcd4   :  { %v779_v41 = vpop.f32.mrb[8].mxu0 }
 0xcd5   :  { %v780_v15 = vadd.f32 %v2595_v10, %v779_v41  ;;  %v2029_v16 = vpop.f32.mrb[9].mxu0 }
 0xcd7   :  { %v791_v19 = vadd.f32 %v789_v18, %v780_v15 }
 0xcd9   :  { %v792_v21 = vmul.f32 0.5, %v791_v19 }
 0xcdb   :  { %2296 = vtanh.f32 %v792_v21 }
 0xce5   :  { %v2297_v22 = vpop.eup %2296 }
 0xce6   :  { %v794_v23 = vadd.f32 1.0, %v2297_v22 }
 0xce8   :  { %v795_v24 = vmul.f32 0.5, %v794_v23 }
 0xcea   :  { %v801_v26 = vmul.f32 %v799_v25, %v795_v24  ;;  %v808_v35 = vsub.f32 1.0, %v795_v24  ;;  %v814_v38 = vmul.f32 %v795_v24, %v2646_v43 }
 0xcec   :  { %803 = vrot.lane.b32.xlu1 %v801_v26, %s2367_s17 }
 0xd5e   :  { %v804_v30 = vpop.permute.xlu1 %803 }
 0xd5f   :  { %v806_v31 = vadd.f32 %v804_v30, %v780_v15 }
 0xd61   :  { %2298 = vtanh.f32 %v806_v31 }
 0xd6b   :  { %v2299_v32 = vpop.eup %2298 }
 0xd6c   :  { %810 = vrot.lane.b32.xlu0 %v2299_v32, %s2370_s0 }
 0xdde   :  { %v811_v37 = vpop.permute.xlu0 %810 }
 0xddf   :  { %v813_v42 = vmul.f32 %v811_v37, %v808_v35 }
 0xde1   :  { %v2692_v44 = vadd.f32 %v814_v38, %v813_v42 }
 0xde3   :  { %v817_v45 = vsel %vm62_vm0, %v710_v13, %v2692_v44 }
 0xde4   :  { %1925 = vmatmul.mubr.msk.f32.vlgmr.msra.gmra.mrb[10].mxu0 %vm174_vm2, %v817_v45 }
 0xde5   :  { %2199 = vmatpush3.bf16.msra.mxu0 %v2541_v55  ;;  %2049 = vmatprep.mubr.msk.f32.mxu0 %vm2369_vm1, %v2366_v7 }
 0xde6   :  { %2200 = vmatprep.subr.bf16.mxu0 %v2368_v54 }
 0xde9   :  { %2202 = vmatpush3.bf16.msra.mxu0 %v2556_v59 }
 0xdea   :  { %2204 = vmatprep.subr.bf16.mxu0 %v2422_v3 }
 0xeb7   :  { %v887_v43 = vpop.f32.mrb[10].mxu0 }
 0xeb8   :  { %v900_v46 = vadd.f32 %v887_v43, %v2516_v36  ;;  %v889_v47 = vpop.f32.mrb[11].mxu0  ;;  %v893_v48 = vrot.slane %v887_v43, 4 }
 0xeb9   :  { %v1011_v63 = vadd.f32 %v2488_v27, %v889_v47 }
 0xeba   :  { %v902_v39 = vrot.slane %v900_v46, 4  ;;  %v895_v49 = vadd.f32 %v893_v48, %v2661_v50 }
 0xebc   :  { %903 = vrot.lane.b32.xlu1 %v902_v39, %s2367_s17  ;;  %v896_v51 = vmul.f32 0.5, %v895_v49 }
 0xebe   :  { %2300 = vtanh.f32 %v896_v51  ;;  %v2752_v51 = vadd.f32 %v2523_v40, %v2580_v5 }
 0xec8   :  { %v2301_v52 = vpop.eup %2300 }
 0xec9   :  { %v898_v53 = vadd.f32 1.0, %v2301_v52 }
 0xecb   :  { %v899_v56 = vmul.f32 0.5, %v898_v53 }
 0xecd   :  { %v913_v0 = vsub.f32 1.0, %v899_v56  ;;  %v921_v6 = vmul.f32 %v919_v34, %v899_v56 }
 0xf2e   :  { %v904_v57 = vpop.permute.xlu1 %903 }
 0xf2f   :  { %v906_v58 = vmul.f32 %v904_v57, %v899_v56 }
 0xf31   :  { %908 = vrot.lane.b32.xlu0 %v906_v58, %s2367_s17 }
 0xfa3   :  { %v909_v60 = vpop.permute.xlu0 %908 }
 0xfa4   :  { %v911_v61 = vadd.f32 %v909_v60, %v2661_v50 }
 0xfa6   :  { %2302 = vtanh.f32 %v911_v61 }
 0xfb0   :  { %v2303_v62 = vpop.eup %2302 }
 0xfb1   :  { %915 = vrot.lane.b32.xlu1 %v2303_v62, %s2370_s0 }
 0xfb5   :  { %1000 = vrot.lane.b32.xlu1 %v887_v43, %s2371_s4 }
 0xfb9   :  { %1013 = vrot.lane.b32.xlu1 %v1011_v63, %s2370_s0 }
0x1023   :  { %v916_v1 = vpop.permute.xlu1 %915 }
0x1024   :  { %v918_v12 = vmul.f32 %v916_v1, %v913_v0 }
0x1026   :  { %v2713_v13 = vadd.f32 %v921_v6, %v918_v12 }
0x1027   :  { %v1001_v14 = vpop.permute.xlu1 %1000 }
0x1028   :  { %v924_v50 = vrot.slane %v2713_v13, 4 }
0x102a   :  { %925 = vrot.lane.b32.xlu0 %v924_v50, %s2370_s0 }
0x102b   :  { %v1014_v25 = vpop.permute.xlu1 %1013 }
0x102e   :  { %1002 = vrot.lane.b32.xlu0 %v889_v47, %s2371_s4 }
0x109c   :  { %v926_v11 = vpop.permute.xlu0 %925 }
0x109d   :  { %2039 = vmatmul.mubr.msk.f32.vlgmr.msra.gmra.mrb[6].mxu1 %vm62_vm0, %v926_v11 }
0x109e   :  { %2184 = vmatpush1.bf16.msra.mxu1 %v2434_v8  ;;  %1106 = vmatprep.mubr.f32.mxu1 %v2366_v7 }
0x109f   :  { %2186 = vmatprep.subr.bf16.mxu1 %v2436_v9 }
0x10a0   :  { %v1003_v2 = vpop.permute.xlu0 %1002 }
0x10a1   :  { %v1004_v18 = vsel %vm62_vm0, %v1001_v14, %v1003_v2 }
0x10a2   :  { %2188 = vmatpush1.bf16.msra.mxu1 %v2458_v17 }
0x10a3   :  { %2190 = vmatprep.subr.bf16.mxu1 %v2467_v20 }
0x10a6   :  { %2192 = vmatpush1.bf16.msra.mxu1 %v2491_v28 }
0x10a7   :  { %2194 = vmatprep.subr.bf16.mxu1 %v2496_v29 }
0x10aa   :  { %2196 = vmatpush1.bf16.msra.mxu1 %v2508_v33 }
0x10ab   :  { %2219 = vmatprep.subr.bf16.mxu1 %v2368_v54 }
0x1170   :  { %v995_v41 = vpop.f32.mrb[6].mxu1 }
0x1171   :  { %v996_v15 = vadd.f32 %v2595_v10, %v995_v41  ;;  %v2040_v16 = vpop.f32.mrb[7].mxu1 }
0x1173   :  { %v1006_v19 = vadd.f32 %v1004_v18, %v996_v15 }
0x1175   :  { %v1007_v21 = vmul.f32 0.5, %v1006_v19 }
0x1177   :  { %2304 = vtanh.f32 %v1007_v21 }
0x1181   :  { %v2305_v22 = vpop.eup %2304 }
0x1182   :  { %v1009_v23 = vadd.f32 1.0, %v2305_v22 }
0x1184   :  { %v1010_v24 = vmul.f32 0.5, %v1009_v23 }
0x1186   :  { %v1016_v26 = vmul.f32 %v1014_v25, %v1010_v24  ;;  %v1023_v35 = vsub.f32 1.0, %v1010_v24  ;;  %v1029_v38 = vmul.f32 %v1010_v24, %v2692_v44 }
0x1188   :  { %1018 = vrot.lane.b32.xlu0 %v1016_v26, %s2367_s17 }
0x118c   :  { %1031 = vrot.lane.b32.xlu0 %v2713_v13, %s2370_s0 }
0x11fa   :  { %v1019_v30 = vpop.permute.xlu0 %1018 }
0x11fb   :  { %v1021_v31 = vadd.f32 %v1019_v30, %v996_v15 }
0x11fd   :  { %2306 = vtanh.f32 %v1021_v31 }
0x11fe   :  { %v1032_v46 = vpop.permute.xlu0 %1031 }
0x1207   :  { %v2307_v32 = vpop.eup %2306 }
0x1208   :  { %1025 = vrot.lane.b32.xlu1 %v2307_v32, %s2370_s0 }
0x127a   :  { %v1026_v37 = vpop.permute.xlu1 %1025 }
0x127b   :  { %v1028_v42 = vmul.f32 %v1026_v37, %v1023_v35 }
0x127d   :  { %v2737_v45 = vadd.f32 %v1029_v38, %v1028_v42 }
0x127f   :  { %v1035_v43 = vrot.slane %v2737_v45, 4 }
0x1281   :  { %v1037_v47 = vsel %vm62_vm0, %v1032_v46, %v1035_v43 }
0x1282   :  { %v1039_v39 = vrot.slane %v1037_v47, 4 }
0x1284   :  { %1927 = vmatmul.mubr.msk.f32.vlgmr.msra.gmra.mrb[8].mxu1 %vm174_vm2, %v1039_v39 }
0x1285   :  { %2221 = vmatpush3.bf16.msra.mxu1 %v2541_v55  ;;  %2060 = vmatprep.mubr.msk.f32.mxu1 %vm2369_vm1, %v2366_v7 }
0x1286   :  { %2222 = vmatprep.subr.bf16.mxu1 %v2368_v54 }
0x1289   :  { %2224 = vmatpush3.bf16.msra.mxu1 %v2556_v59 }
0x128a   :  { %2226 = vmatprep.subr.bf16.mxu1 %v2422_v3 }
0x1357   :  { %v1108_v44 = vpop.f32.mrb[8].mxu1 }
0x1358   :  { %v1118_v48 = vadd.f32 %v1108_v44, %v2516_v36  ;;  %v1110_v49 = vpop.f32.mrb[9].mxu1  ;;  %v1113_v52 = vadd.f32 %v1108_v44, %v2752_v51 }
0x1359   :  { %v1227_v5 = vadd.f32 %v2488_v27, %v1110_v49 }
0x135a   :  { %1120 = vrot.lane.b32.xlu1 %v1118_v48, %s2367_s17  ;;  %v1114_v53 = vmul.f32 0.5, %v1113_v52 }
0x135c   :  { %2308 = vtanh.f32 %v1114_v53 }
0x1366   :  { %v2309_v56 = vpop.eup %2308 }
0x1367   :  { %v1116_v57 = vadd.f32 1.0, %v2309_v56 }
0x1369   :  { %v1117_v58 = vmul.f32 0.5, %v1116_v57 }
0x136b   :  { %v1130_v0 = vsub.f32 1.0, %v1117_v58  ;;  %v1137_v6 = vmul.f32 %v1117_v58, %v924_v50 }
0x13cc   :  { %v1121_v60 = vpop.permute.xlu1 %1120 }
0x13cd   :  { %v1123_v61 = vmul.f32 %v1121_v60, %v1117_v58 }
0x13cf   :  { %1125 = vrot.lane.b32.xlu0 %v1123_v61, %s2367_s17 }
0x1441   :  { %v1126_v62 = vpop.permute.xlu0 %1125 }
0x1442   :  { %v1128_v63 = vadd.f32 %v1126_v62, %v2752_v51 }
0x1444   :  { %2310 = vtanh.f32 %v1128_v63 }
0x144e   :  { %v2311_v34 = vpop.eup %2310 }
0x144f   :  { %1132 = vrot.lane.b32.xlu1 %v2311_v34, %s2370_s0 }
0x1453   :  { %1216 = vrot.lane.b32.xlu1 %v1108_v44, %s2371_s4 }
0x1457   :  { %1229 = vrot.lane.b32.xlu1 %v1227_v5, %s2370_s0 }
0x14c1   :  { %v1133_v1 = vpop.permute.xlu1 %1132 }
0x14c2   :  { %v1135_v12 = vmul.f32 %v1133_v1, %v1130_v0 }
0x14c4   :  { %v2763_v11 = vadd.f32 %v1137_v6, %v1135_v12 }
0x14c5   :  { %v1217_v41 = vpop.permute.xlu1 %1216 }
0x14c6   :  { %1140 = vrot.lane.b32.xlu0 %v2763_v11, %s2370_s0  ;;  %v1350_v63 = vrot.slane %v2763_v11, 4 }
0x14c9   :  { %v1230_v24 = vpop.permute.xlu1 %1229 }
0x14ca   :  { %1218 = vrot.lane.b32.xlu0 %v1110_v49, %s2371_s4 }
0x1538   :  { %v1141_v2 = vpop.permute.xlu0 %1140 }
0x1539   :  { %2050 = vmatmul.mubr.msk.f32.vlgmr.msra.gmra.mrb[12].mxu0 %vm62_vm0, %v1141_v2 }
0x153a   :  { %2206 = vmatpush1.bf16.msra.mxu0 %v2434_v8  ;;  %1316 = vmatprep.mubr.f32.mxu0 %v2366_v7 }
0x153b   :  { %2208 = vmatprep.subr.bf16.mxu0 %v2436_v9 }
0x153c   :  { %v1219_v13 = vpop.permute.xlu0 %1218 }
0x153d   :  { %v1220_v16 = vsel %vm62_vm0, %v1217_v41, %v1219_v13 }
0x153e   :  { %2210 = vmatpush1.bf16.msra.mxu0 %v2458_v17 }
0x153f   :  { %2212 = vmatprep.subr.bf16.mxu0 %v2467_v20 }
0x1542   :  { %2214 = vmatpush1.bf16.msra.mxu0 %v2491_v28 }
0x1543   :  { %2216 = vmatprep.subr.bf16.mxu0 %v2496_v29 }
0x1546   :  { %2218 = vmatpush1.bf16.msra.mxu0 %v2508_v33 }
0x1547   :  { %2241 = vmatprep.subr.bf16.mxu0 %v2368_v54 }
0x160c   :  { %v1210_v50 = vpop.f32.mrb[12].mxu0 }
0x160d   :  { %v1211_v14 = vadd.f32 %v2595_v10, %v1210_v50  ;;  %v2051_v15 = vpop.f32.mrb[13].mxu0 }
0x160f   :  { %v1222_v18 = vadd.f32 %v1220_v16, %v1211_v14 }
0x1611   :  { %v1223_v19 = vmul.f32 0.5, %v1222_v18 }
0x1613   :  { %2312 = vtanh.f32 %v1223_v19 }
0x161d   :  { %v2313_v21 = vpop.eup %2312 }
0x161e   :  { %v1225_v22 = vadd.f32 1.0, %v2313_v21 }
0x1620   :  { %v1226_v23 = vmul.f32 0.5, %v1225_v22 }
0x1622   :  { %v1232_v25 = vmul.f32 %v1230_v24, %v1226_v23  ;;  %v1239_v32 = vsub.f32 1.0, %v1226_v23  ;;  %v1245_v37 = vmul.f32 %v1226_v23, %v2737_v45 }
0x1624   :  { %1234 = vrot.lane.b32.xlu0 %v1232_v25, %s2367_s17 }
0x1696   :  { %v1235_v26 = vpop.permute.xlu0 %1234 }
0x1697   :  { %v1237_v30 = vadd.f32 %v1235_v26, %v1211_v14 }
0x1699   :  { %2314 = vtanh.f32 %v1237_v30 }
0x16a3   :  { %v2315_v31 = vpop.eup %2314 }
0x16a4   :  { %1241 = vrot.lane.b32.xlu1 %v2315_v31, %s2370_s0 }
0x1716   :  { %v1242_v35 = vpop.permute.xlu1 %1241 }
0x1717   :  { %v1244_v38 = vmul.f32 %v1242_v35, %v1239_v32 }
0x1719   :  { %v2783_v42 = vadd.f32 %v1245_v37, %v1244_v38 }
0x171b   :  { %v1248_v43 = vsel %vm62_vm0, %v1141_v2, %v2783_v42 }
0x171c   :  { %1929 = vmatmul.mubr.msk.f32.vlgmr.msra.gmra.mrb[14].mxu0 %vm174_vm2, %v1248_v43 }
0x171d   :  { %2243 = vmatpush3.bf16.msra.mxu0 %v2541_v55  ;;  %2071 = vmatprep.mubr.msk.f32.mxu0 %vm2369_vm1, %v2366_v7 }
0x171e   :  { %2244 = vmatprep.subr.bf16.mxu0 %v2368_v54 }
0x1721   :  { %2246 = vmatpush3.bf16.msra.mxu0 %v2556_v59 }
0x1722   :  { %2248 = vmatprep.subr.bf16.mxu0 %v2422_v3 }
0x17ef   :  { %v1318_v45 = vpop.f32.mrb[14].mxu0 }
0x17f0   :  { %v1331_v46 = vadd.f32 %v1318_v45, %v2516_v36  ;;  %v1320_v47 = vpop.f32.mrb[15].mxu0  ;;  %v1324_v44 = vrot.slane %v1318_v45, 4 }
0x17f1   :  { %v1442_v62 = vadd.f32 %v2488_v27, %v1320_v47 }
0x17f2   :  { %v1333_v39 = vrot.slane %v1331_v46, 4  ;;  %v1326_v48 = vadd.f32 %v1324_v44, %v2752_v51 }
0x17f4   :  { %1334 = vrot.lane.b32.xlu0 %v1333_v39, %s2367_s17  ;;  %v1327_v49 = vmul.f32 0.5, %v1326_v48  ;;  %v2842_v39 = vadd.f32 %v2578_v4, %v2523_v40  ;;  %v2852_v40 = vld [vmem:[%s2917_s6] ss:$0 sm:$0xff] }
0x17f6   :  { %2316 = vtanh.f32 %v1327_v49 }
0x1800   :  { %v2317_v52 = vpop.eup %2316 }
0x1801   :  { %v1329_v53 = vadd.f32 1.0, %v2317_v52 }
0x1803   :  { %v1330_v56 = vmul.f32 0.5, %v1329_v53 }
0x1805   :  { %v1344_v34 = vsub.f32 1.0, %v1330_v56  ;;  %v1352_v0 = vmul.f32 %v1350_v63, %v1330_v56 }
0x1866   :  { %v1335_v57 = vpop.permute.xlu0 %1334 }
0x1867   :  { %v1337_v58 = vmul.f32 %v1335_v57, %v1330_v56 }
0x1869   :  { %1339 = vrot.lane.b32.xlu1 %v1337_v58, %s2367_s17 }
0x18db   :  { %v1340_v3 = vpop.permute.xlu1 %1339 }
0x18dc   :  { %v1342_v60 = vadd.f32 %v1340_v3, %v2752_v51 }
0x18de   :  { %2318 = vtanh.f32 %v1342_v60 }
0x18e8   :  { %v2319_v61 = vpop.eup %2318 }
0x18e9   :  { %1346 = vrot.lane.b32.xlu0 %v2319_v61, %s2370_s0 }
0x18ed   :  { %1431 = vrot.lane.b32.xlu0 %v1318_v45, %s2371_s4 }
0x18f1   :  { %1444 = vrot.lane.b32.xlu0 %v1442_v62, %s2370_s0 }
0x195b   :  { %v1347_v5 = vpop.permute.xlu0 %1346 }
0x195c   :  { %v1349_v1 = vmul.f32 %v1347_v5, %v1344_v34 }
0x195e   :  { %v2804_v6 = vadd.f32 %v1352_v0, %v1349_v1 }
0x195f   :  { %v1432_v2 = vpop.permute.xlu0 %1431 }
0x1960   :  { %v1355_v51 = vrot.slane %v2804_v6, 4 }
0x1962   :  { %1356 = vrot.lane.b32.xlu1 %v1355_v51, %s2370_s0 }
0x1963   :  { %v1445_v21 = vpop.permute.xlu0 %1444 }
0x1966   :  { %1433 = vrot.lane.b32.xlu1 %v1320_v47, %s2371_s4 }
0x19d4   :  { %v1357_v12 = vpop.permute.xlu1 %1356 }
0x19d5   :  { %2061 = vmatmul.mubr.msk.f32.vlgmr.msra.gmra.mrb[10].mxu1 %vm62_vm0, %v1357_v12 }
0x19d6   :  { %2228 = vmatpush1.bf16.msra.mxu1 %v2434_v8  ;;  %1537 = vmatprep.mubr.f32.mxu1 %v2366_v7 }
0x19d7   :  { %2230 = vmatprep.subr.bf16.mxu1 %v2436_v9 }
0x19d8   :  { %v1434_v27 = vpop.permute.xlu1 %1433 }
0x19d9   :  { %v1435_v41 = vsel %vm62_vm0, %v1432_v2, %v1434_v27 }
0x19da   :  { %2232 = vmatpush1.bf16.msra.mxu1 %v2458_v17 }
0x19db   :  { %2234 = vmatprep.subr.bf16.mxu1 %v2467_v20 }
0x19de   :  { %2236 = vmatpush1.bf16.msra.mxu1 %v2491_v28 }
0x19df   :  { %2238 = vmatprep.subr.bf16.mxu1 %v2496_v29 }
0x19e2   :  { %2240 = vmatpush1.bf16.msra.mxu1 %v2508_v33 }
0x19e3   :  { %2263 = vmatprep.subr.bf16.mxu1 %v2368_v54 }
0x1aa8   :  { %v1426_v11 = vpop.f32.mrb[10].mxu1 }
0x1aa9   :  { %v1427_v13 = vadd.f32 %v2595_v10, %v1426_v11  ;;  %v2062_v50 = vpop.f32.mrb[11].mxu1 }
0x1aab   :  { %v1437_v14 = vadd.f32 %v1435_v41, %v1427_v13 }
0x1aad   :  { %v1438_v15 = vmul.f32 0.5, %v1437_v14 }
0x1aaf   :  { %2320 = vtanh.f32 %v1438_v15 }
0x1ab9   :  { %v2321_v16 = vpop.eup %2320 }
0x1aba   :  { %v1440_v18 = vadd.f32 1.0, %v2321_v16 }
0x1abc   :  { %v1441_v19 = vmul.f32 0.5, %v1440_v18 }
0x1abe   :  { %v1447_v22 = vmul.f32 %v1445_v21, %v1441_v19  ;;  %v1454_v26 = vsub.f32 1.0, %v1441_v19  ;;  %v1460_v31 = vmul.f32 %v1441_v19, %v2783_v42 }
0x1ac0   :  { %1449 = vrot.lane.b32.xlu1 %v1447_v22, %s2367_s17 }
0x1ac4   :  { %1462 = vrot.lane.b32.xlu1 %v2804_v6, %s2370_s0 }
0x1b32   :  { %v1450_v23 = vpop.permute.xlu1 %1449 }
0x1b33   :  { %v1452_v24 = vadd.f32 %v1450_v23, %v1427_v13 }
0x1b35   :  { %2322 = vtanh.f32 %v1452_v24 }
0x1b36   :  { %v1463_v38 = vpop.permute.xlu1 %1462 }
0x1b3f   :  { %v2323_v25 = vpop.eup %2322 }
0x1b40   :  { %1456 = vrot.lane.b32.xlu0 %v2323_v25, %s2370_s0 }
0x1bb2   :  { %v1457_v30 = vpop.permute.xlu0 %1456 }
0x1bb3   :  { %v1459_v32 = vmul.f32 %v1457_v30, %v1454_v26 }
0x1bb5   :  { %v2828_v35 = vadd.f32 %v1460_v31, %v1459_v32 }
0x1bb7   :  { %v1466_v37 = vrot.slane %v2828_v35, 4 }
0x1bb9   :  { %v1468_v43 = vsel %vm62_vm0, %v1463_v38, %v1466_v37 }
0x1bba   :  { %v1470_v45 = vrot.slane %v1468_v43, 4 }
0x1bbc   :  { %1931 = vmatmul.mubr.msk.f32.vlgmr.msra.gmra.mrb[12].mxu1 %vm174_vm2, %v1470_v45 }
0x1bbd   :  { %2265 = vmatpush3.bf16.msra.mxu1 %v2541_v55  ;;  %2082 = vmatprep.mubr.msk.f32.mxu1 %vm2369_vm1, %v2366_v7 }
0x1bbe   :  { %2266 = vmatprep.subr.bf16.mxu1 %v2368_v54 }
0x1bc1   :  { %2268 = vmatpush3.bf16.msra.mxu1 %v2556_v59 }
0x1c8f   :  { %v1539_v42 = vpop.f32.mrb[12].mxu1 }
0x1c90   :  { %v1549_v46 = vadd.f32 %v1539_v42, %v2516_v36  ;;  %v1541_v47 = vpop.f32.mrb[13].mxu1  ;;  %v1544_v44 = vadd.f32 %v1539_v42, %v2842_v39 }
0x1c91   :  { %v1658_v4 = vadd.f32 %v2852_v40, %v1541_v47 }
0x1c92   :  { %1551 = vrot.lane.b32.xlu0 %v1549_v46, %s2367_s17  ;;  %v1545_v55 = vmul.f32 0.5, %v1544_v44 }
0x1c94   :  { %2324 = vtanh.f32 %v1545_v55 }
0x1c9e   :  { %v2325_v48 = vpop.eup %2324 }
0x1c9f   :  { %v1547_v49 = vadd.f32 1.0, %v2325_v48 }
0x1ca1   :  { %v1548_v52 = vmul.f32 0.5, %v1547_v49  ;;  %v2341_v49 = vld [vmem:[%s2916_s5] ss:$0 sm:$0xff]  ;;  %s2372_s5 = smov [#allocation2]  }
0x1ca2   :  { %s1905_s18 = sshll.u32 %s2372_s5, 4  ;;  %s1906_s18 = int_to_ptr.vmem [resolvable:$true] %s1905_s18 }
0x1ca3   :  { %v1561_v58 = vsub.f32 1.0, %v1548_v52  ;;  %v1568_v60 = vmul.f32 %v1548_v52, %v1355_v51  ;;  %p2347_p1 = scmp.lt.s32.totalorder %s1906_s18, %s1906_s18 }
0x1d04   :  { %v1552_v54 = vpop.permute.xlu0 %1551 }
0x1d05   :  { %v1554_v53 = vmul.f32 %v1552_v54, %v1548_v52 }
0x1d07   :  { %1556 = vrot.lane.b32.xlu1 %v1554_v53, %s2367_s17 }
0x1d79   :  { %v1557_v59 = vpop.permute.xlu1 %1556 }
0x1d7a   :  { %v1559_v56 = vadd.f32 %v1557_v59, %v2842_v39 }
0x1d7c   :  { %2326 = vtanh.f32 %v1559_v56 }
0x1d86   :  { %v2327_v57 = vpop.eup %2326 }
0x1d87   :  { %1563 = vrot.lane.b32.xlu0 %v2327_v57, %s2370_s0 }
0x1d8b   :  { %1647 = vrot.lane.b32.xlu0 %v1539_v42, %s2371_s4 }
0x1d8f   :  { %1660 = vrot.lane.b32.xlu0 %v1658_v4, %s2370_s0 }
0x1df9   :  { %v1564_v3 = vpop.permute.xlu0 %1563 }
0x1dfa   :  { %v1566_v61 = vmul.f32 %v1564_v3, %v1561_v58 }
0x1dfc   :  { %v2858_v62 = vadd.f32 %v1568_v60, %v1566_v61 }
0x1dfd   :  { %v1648_v0 = vpop.permute.xlu0 %1647 }
0x1dfe   :  { %1571 = vrot.lane.b32.xlu1 %v2858_v62, %s2370_s0  ;;  %v1781_v37 = vrot.slane %v2858_v62, 4 }
0x1e01   :  { %v1661_v12 = vpop.permute.xlu0 %1660 }
0x1e02   :  { %1649 = vrot.lane.b32.xlu1 %v1541_v47, %s2371_s4 }
0x1e70   :  { %v1572_v63 = vpop.permute.xlu1 %1571 }
0x1e71   :  { %2072 = vmatmul.mubr.msk.f32.vlgmr.msra.gmra.mrb[16].mxu0 %vm62_vm0, %v1572_v63 }
0x1e72   :  { %2250 = vmatpush1.bf16.msra.mxu0 %v2434_v8  ;;  %1747 = vmatprep.mubr.f32.mxu0 %v2366_v7 }
0x1e73   :  { %2252 = vmatprep.subr.bf16.mxu0 %v2436_v9 }
0x1e74   :  { %v1650_v34 = vpop.permute.xlu1 %1649 }
0x1e75   :  { %v1651_v7 = vsel %vm62_vm0, %v1648_v0, %v1650_v34 }
0x1e76   :  { %2254 = vmatpush1.bf16.msra.mxu0 %v2458_v17 }
0x1e77   :  { %2256 = vmatprep.subr.bf16.mxu0 %v2467_v20 }
0x1e7a   :  { %2258 = vmatpush1.bf16.msra.mxu0 %v2491_v28 }
0x1e7b   :  { %2260 = vmatprep.subr.bf16.mxu0 %v2496_v29 }
0x1e7e   :  { %2262 = vmatpush1.bf16.msra.mxu0 %v2508_v33 }
0x1f44   :  { %v1641_v5 = vpop.f32.mrb[16].mxu0 }
0x1f45   :  { %v1642_v1 = vadd.f32 %v2595_v10, %v1641_v5  ;;  %v2073_v8 = vpop.f32.mrb[17].mxu0 }
0x1f47   :  { %v1653_v6 = vadd.f32 %v1651_v7, %v1642_v1 }
0x1f49   :  { %v1654_v9 = vmul.f32 0.5, %v1653_v6 }
0x1f4b   :  { %2328 = vtanh.f32 %v1654_v9 }
0x1f55   :  { %v2329_v17 = vpop.eup %2328 }
0x1f56   :  { %v1656_v51 = vadd.f32 1.0, %v2329_v17 }
0x1f58   :  { %v1657_v20 = vmul.f32 0.5, %v1656_v51 }
0x1f5a   :  { %v1663_v28 = vmul.f32 %v1661_v12, %v1657_v20  ;;  %v1670_v10 = vsub.f32 1.0, %v1657_v20  ;;  %v1676_v2 = vmul.f32 %v1657_v20, %v2828_v35 }
0x1f5c   :  { %1665 = vrot.lane.b32.xlu1 %v1663_v28, %s2367_s17 }
0x1fce   :  { %v1666_v29 = vpop.permute.xlu1 %1665 }
0x1fcf   :  { %v1668_v33 = vadd.f32 %v1666_v29, %v1642_v1 }
0x1fd1   :  { %2330 = vtanh.f32 %v1668_v33 }
0x1fdb   :  { %v2331_v27 = vpop.eup %2330 }
0x1fdc   :  { %1672 = vrot.lane.b32.xlu0 %v2331_v27, %s2370_s0 }
0x204e   :  { %v1673_v11 = vpop.permute.xlu0 %1672 }
0x204f   :  { %v1675_v13 = vmul.f32 %v1673_v11, %v1670_v10 }
0x2051   :  { %v1677_v50 = vadd.f32 %v1676_v2, %v1675_v13 }
0x2053   :  { %v1679_v41 = vsel %vm62_vm0, %v1572_v63, %v1677_v50 }
0x2054   :  { %1933 = vmatmul.mubr.msk.f32.vlgmr.msra.gmra.mrb[18].mxu0 %vm174_vm2, %v1679_v41 }
0x2127   :  { %v1749_v14 = vpop.f32.mrb[18].mxu0 }
0x2128   :  { %v1762_v15 = vadd.f32 %v1749_v14, %v2516_v36  ;;  %v1751_v16 = vpop.f32.mrb[19].mxu0  ;;  %v1755_v19 = vrot.slane %v1749_v14, 4 }
0x2129   :  { %v1873_v35 = vadd.f32 %v2852_v40, %v1751_v16 }
0x212a   :  { %v1764_v18 = vrot.slane %v1762_v15, 4  ;;  %v1757_v21 = vadd.f32 %v1755_v19, %v2842_v39 }
0x212c   :  { %1765 = vrot.lane.b32.xlu1 %v1764_v18, %s2367_s17  ;;  %v1758_v22 = vmul.f32 0.5, %v1757_v21 }
0x212e   :  { %2332 = vtanh.f32 %v1758_v22 }
0x2138   :  { %v2333_v23 = vpop.eup %2332 }
0x2139   :  { %v1760_v24 = vadd.f32 1.0, %v2333_v23 }
0x213b   :  { %v1761_v25 = vmul.f32 0.5, %v1760_v24 }
0x213d   :  { %v1775_v38 = vsub.f32 1.0, %v1761_v25  ;;  %v1783_v45 = vmul.f32 %v1781_v37, %v1761_v25 }
0x219e   :  { %v1766_v26 = vpop.permute.xlu1 %1765 }
0x219f   :  { %v1768_v30 = vmul.f32 %v1766_v26, %v1761_v25 }
0x21a1   :  { %1770 = vrot.lane.b32.xlu0 %v1768_v30, %s2367_s17 }
0x2213   :  { %v1771_v31 = vpop.permute.xlu0 %1770 }
0x2214   :  { %v1773_v32 = vadd.f32 %v1771_v31, %v2842_v39 }
0x2216   :  { %2334 = vtanh.f32 %v1773_v32 }
0x2220   :  { %v2335_v36 = vpop.eup %2334 }
0x2221   :  { %1777 = vrot.lane.b32.xlu1 %v2335_v36, %s2370_s0 }
0x2225   :  { %1862 = vrot.lane.b32.xlu1 %v1749_v14, %s2371_s4 }
0x2229   :  { %1875 = vrot.lane.b32.xlu1 %v1873_v35, %s2370_s0 }
0x2293   :  { %v1778_v43 = vpop.permute.xlu1 %1777 }
0x2294   :  { %v1780_v42 = vmul.f32 %v1778_v43, %v1775_v38 }
0x2296   :  { %v1784_v46 = vadd.f32 %v1783_v45, %v1780_v42 }
0x2297   :  { %v1863_v48 = vpop.permute.xlu1 %1862 }
0x2298   :  { %v1786_v47 = vrot.slane %v1784_v46, 4 }
0x229a   :  { %1787 = vrot.lane.b32.xlu0 %v1786_v47, %s2370_s0 }
0x229b   :  { %v1876_v58 = vpop.permute.xlu1 %1875 }
0x229e   :  { %1864 = vrot.lane.b32.xlu0 %v1751_v16, %s2371_s4 }
0x230c   :  { %v1788_v39 = vpop.permute.xlu0 %1787 }
0x230d   :  { %2083 = vmatmul.mubr.msk.f32.vlgmr.msra.gmra.mrb[14].mxu1 %vm62_vm0, %v1788_v39 }
0x2310   :  { %v1865_v44 = vpop.permute.xlu0 %1864 }
0x2311   :  { %v1866_v53 = vsel %vm62_vm0, %v1863_v48, %v1865_v44 }
0x23e0   :  { %v1857_v55 = vpop.f32.mrb[14].mxu1 }
0x23e1   :  { %v1858_v52 = vadd.f32 %v2341_v49, %v1857_v55  ;;  %v2084_v54 = vpop.f32.mrb[15].mxu1 }
0x23e3   :  { %v1868_v59 = vadd.f32 %v1866_v53, %v1858_v52 }
0x23e5   :  { %v1869_v56 = vmul.f32 0.5, %v1868_v59 }
0x23e7   :  { %2336 = vtanh.f32 %v1869_v56 }
0x23f1   :  { %v2337_v57 = vpop.eup %2336 }
0x23f2   :  { %v1871_v40 = vadd.f32 1.0, %v2337_v57 }
0x23f4   :  { %v1872_v4 = vmul.f32 0.5, %v1871_v40 }
0x23f6   :  { %v1878_v3 = vmul.f32 %v1876_v58, %v1872_v4  ;;  %v1885_v63 = vsub.f32 1.0, %v1872_v4  ;;  %v1891_v5 = vmul.f32 %v1872_v4, %v1677_v50 }
0x23f8   :  { %1880 = vrot.lane.b32.xlu0 %v1878_v3, %s2367_s17  ;;  %s2342_s17 = scalar_lea.vmem %s1906_s18, 64 }
0x23f9   :  { %p2343_p0 = scmp.ne.s32.totalorder %s1906_s18, %s2342_s17  ;;  %p2348_p2 = scmp.lt.s32.totalorder %s2342_s17, %s2342_s17 }
0x23fb   :  { %p2349_p3 = por %p2348_p2, %p2347_p1 }
0x23fd   :  { %p2350_p4 = pnand %p2349_p3, %p2343_p0 }
0x246a   :  { %v1881_v60 = vpop.permute.xlu0 %1880 }
0x246b   :  { %v1883_v61 = vadd.f32 %v1881_v60, %v1858_v52 }
0x246d   :  { %2338 = vtanh.f32 %v1883_v61 }
0x2477   :  { %v2339_v62 = vpop.eup %2338 }
0x2478   :  { %1887 = vrot.lane.b32.xlu1 %v2339_v62, %s2370_s0 }
0x24ea   :  { %v1888_v34 = vpop.permute.xlu1 %1887 }
0x24eb   :  { %v1890_v0 = vmul.f32 %v1888_v34, %v1885_v63 }
0x24ed   :  { %v1892_v1 = vadd.f32 %v1891_v5, %v1890_v0 }
0x24ef   :  { %1894 = vrot.lane.b32.xlu0 %v1892_v1, %s2370_s0 }
0x2561   :  { %v1895_v8 = vpop.permute.xlu0 %1894 }
0x2562   :  { %1898 = vst.msk [vmem:[#allocation2] sm:$0xf] %vm1897_vm3, %v1895_v8 }
0x2563   :  { %2353 = shalt.err (!%p2350_p4)
}
0x2564   :  { %s2354_s21 = scalar_lea.hbm %s2918_s7, 64 }
0x2565   :  { %p2355_p5 = scmp.ne.s32.totalorder %s2918_s7, %s2354_s21  ;;  %p2358_p6 = scmp.lt.u32.totalorder %s2354_s21, %s2918_s7 }
0x2567   :  { %p2360_p7 = pnand %p2358_p6, %p2355_p5 }
0x2569   :  { %2363 = shalt.err (!%p2360_p7)
}
0x256a   :  { %1908 = dma.vmem_to_hbm [thread:$0]  %s1906_s18, 64, %s2918_s7, [#allocation3]  }
0x256b   :  { %2364 = dma.done.wait [#allocation3], 64  }
0x256c   :  { %2365 = vsyncadd [#allocation3], 4294967232 }
0x256d   :  { %1912 = vsyncpa [#allocation3], 1 }

</bundles_post_ra>
